<compile_context>
chip_gen: v6e
topology: v6e:2x2x1
jax: 0.10.0
libtpu: 0.0.40
codegen_flags: <defaults>
</compile_context>

<pallas_src>
import functools
import math

import jax
import jax.numpy as jnp
from jax.experimental import pallas as pl
from jax.experimental.pallas import tpu as pltpu


def _layernorm(x, gamma, beta, eps=1e-5):
    mean = jnp.mean(x, axis=-1, keepdims=True)
    var = jnp.mean((x - mean) ** 2, axis=-1, keepdims=True)
    return (x - mean) * jax.lax.rsqrt(var + eps) * gamma + beta


def mab_kernel(*refs, num_heads, use_mult):
    """Fused MAB block over a TB-sized batch tile.

    Ref order: q (1|TB, Lq, D), x (TB, Lk, D), [qm (1|TB, Lq, 1), kvm (1|TB, 1, Lk)],
    wq wk wv wo (D,D) bf16, ln1 g/b (1,D) f32, w1 (D,F) bf16, w2 (F,D) bf16,
    ln2 g/b (1,D) f32, out (TB, Lq, D) f32.  Leading dim 1 == shared across batch.
    """
    if use_mult:
        (q_ref, x_ref, qm_ref, kvm_ref,
         wq_ref, wk_ref, wv_ref, wo_ref,
         g1_ref, b1_ref, w1_ref, w2_ref, g2_ref, b2_ref, o_ref) = refs
    else:
        (q_ref, x_ref,
         wq_ref, wk_ref, wv_ref, wo_ref,
         g1_ref, b1_ref, w1_ref, w2_ref, g2_ref, b2_ref, o_ref) = refs
        qm_ref = kvm_ref = None

    TB, Lq, D = o_ref.shape
    Lk = x_ref.shape[1]
    H = num_heads
    hd = D // H
    scale = 1.0 / math.sqrt(hd)
    q_shared = q_ref.shape[0] == 1

    # --- QKV projections on the flattened slab: 3 MXU matmuls per grid step
    #     (bf16 inputs, f32 accumulation) instead of 3 per batch element.
    Qf = q_ref[...].reshape(-1, D).astype(jnp.bfloat16)          # (Lq or TB*Lq, D)
    Xf = x_ref[...].reshape(-1, D).astype(jnp.bfloat16)          # (TB*Lk, D)
    qW = jnp.dot(Qf, wq_ref[...], preferred_element_type=jnp.float32)   # f32, unscaled (residual)
    kW = jnp.dot(Xf, wk_ref[...], preferred_element_type=jnp.float32)
    vW = jnp.dot(Xf, wv_ref[...], preferred_element_type=jnp.float32)
    qWs = (qW * scale).astype(jnp.bfloat16)   # fold 1/sqrt(hd) once, only for the scores
    kWb = kW.astype(jnp.bfloat16)
    vWb = vW.astype(jnp.bfloat16)

    rows = []
    for b in range(TB):                                   # static unrolled batch loop
        qb = qWs if q_shared else qWs[b * Lq:(b + 1) * Lq]          # (Lq, D) bf16
        kb = kWb[b * Lk:(b + 1) * Lk]                               # (Lk, D) bf16
        vb = vWb[b * Lk:(b + 1) * Lk]                               # (Lk, D) bf16

        if use_mult:
            qm = qm_ref[0] if qm_ref.shape[0] == 1 else qm_ref[b]       # (Lq, 1) f32
            kvm = kvm_ref[0] if kvm_ref.shape[0] == 1 else kvm_ref[b]   # (1, Lk) f32
            # Rank-1 Frobenius norm factorizes: ||qm kvm^T||_F = ||qm||_2 * ||kvm||_2.
            sq = jnp.sum(qm * qm, keepdims=True)                        # (1, 1)
            sk = jnp.sum(kvm * kvm, keepdims=True)                      # (1, 1)
            inv_fro = pl.reciprocal(jnp.sqrt(sq * sk) + 1e-5, approx=True)
            mult = (qm * kvm) * inv_fro                                 # (Lq, Lk) f32

        acc = jnp.zeros((Lq, D), jnp.float32)
        for h in range(H):                 # heads accumulate through Wo slices (no concat)
            sl = slice(h * hd, (h + 1) * hd)
            s = jax.lax.dot_general(qb[:, sl], kb[:, sl], (((1,), (1,)), ((), ())),
                                    preferred_element_type=jnp.float32)  # (Lq, Lk) f32
            s = s - jnp.max(s, axis=-1, keepdims=True)
            e = jnp.exp(s)
            p = e * pl.reciprocal(jnp.sum(e, axis=-1, keepdims=True), approx=True)
            if use_mult:
                p = p + mult                                  # added AFTER softmax
            hv = jnp.dot(p.astype(jnp.bfloat16), vb[:, sl],
                         preferred_element_type=jnp.float32)  # (Lq, hd)
            acc = acc + jnp.dot(hv.astype(jnp.bfloat16), wo_ref[sl, :],
                                preferred_element_type=jnp.float32)       # += (p@v)@Wo_h
        q_res = qW if q_shared else qW[b * Lq:(b + 1) * Lq]
        rows.append(acc + q_res)                     # attention output + W_q(Q) residual

    R = rows[0] if TB == 1 else jnp.concatenate(rows, axis=0)     # (TB*Lq, D) f32

    # Residual+LN, FFN, residual+LN on the whole flattened slab (big matmuls).
    Hn = _layernorm(R, g1_ref[...], b1_ref[...])
    F1 = jnp.maximum(jnp.dot(Hn.astype(jnp.bfloat16), w1_ref[...],
                             preferred_element_type=jnp.float32), 0.0)
    F2 = jnp.dot(F1.astype(jnp.bfloat16), w2_ref[...],
                 preferred_element_type=jnp.float32)
    O = _layernorm(F2 + Hn, g2_ref[...], b2_ref[...])
    # NOTE: output lane dim is D; for production D >= 128 stores are unmasked.
    o_ref[...] = O.reshape(TB, Lq, D).astype(o_ref.dtype)


def _choose_tb(B, Lq, Lk, D):
    """Largest batch tile that fits a rough activation VMEM budget while keeping
    the grid >= 2 steps (v7x has 2 TensorCores; the batch axis is the only way
    this kernel shards across them)."""
    per_b = 4 * (Lq * D + Lk * D + Lq * D)          # Q + X + out blocks, f32 bytes
    budget = 6 * 1024 * 1024
    tb = 1
    for cand in range(1, B + 1):
        if B % cand:
            continue
        if B >= 2 and B // cand < 2:
            continue
        if 2 * cand * per_b > budget:               # x2 for pipeline double-buffering
            continue
        tb = cand
    return tb


def mab_forward(Q, X, q_mult, kv_mult_t, p, num_heads, use_mult):
    """Q: (1|B, Lq, D); X: (B, Lk, D); q_mult: (1|B, Lq, 1); kv_mult_t: (1|B, 1, Lk).
       Leading-dim-1 arrays are shared across the batch and bound with a constant
       index_map (VMEM-resident, no HBM broadcast). Returns (B, Lq, D) f32."""
    B, Lk, D = X.shape
    Lq = Q.shape[1]
    assert D % num_heads == 0, "num_hiddens must be divisible by num_heads"
    TB = _choose_tb(B, Lq, Lk, D)

    def per_batch_or_shared(arr):
        if arr.shape[0] == 1:
            return pl.BlockSpec((1,) + arr.shape[1:], lambda b: (0, 0, 0))
        return pl.BlockSpec((TB,) + arr.shape[1:], lambda b: (b, 0, 0))

    def full2d(arr):
        return pl.BlockSpec(arr.shape, lambda b: (0, 0))

    # bf16 matmul weights (native MXU dtype, half the DMA); LN params stay f32.
    wq, wk, wv, wo = (p[k].astype(jnp.bfloat16) for k in ("wq", "wk", "wv", "wo"))
    w1, w2 = p["w1"].astype(jnp.bfloat16), p["w2"].astype(jnp.bfloat16)
    weights = (wq, wk, wv, wo, p["ln1_g"], p["ln1_b"], w1, w2, p["ln2_g"], p["ln2_b"])

    mult_args = (q_mult, kv_mult_t) if use_mult else ()
    args = (Q, X) + mult_args + weights

    in_specs = [per_batch_or_shared(Q), per_batch_or_shared(X)]
    if use_mult:
        in_specs += [per_batch_or_shared(q_mult), per_batch_or_shared(kv_mult_t)]
    in_specs += [full2d(w) for w in weights]

    kernel = functools.partial(mab_kernel, num_heads=num_heads, use_mult=use_mult)
    return pl.pallas_call(
        kernel,
        out_shape=jax.ShapeDtypeStruct((B, Lq, D), jnp.float32),
        grid=(B // TB,),
        in_specs=in_specs,
        out_specs=pl.BlockSpec((TB, Lq, D), lambda b: (b, 0, 0)),
        compiler_params=pltpu.CompilerParams(
            dimension_semantics=("parallel",),
            vmem_limit_bytes=32 * 1024 * 1024),
        # TODO(synk): at production D/F sizes on v7x (64 MiB VMEM), additionally tile
        # the FFN over F or use pipeline_mode=pl.Buffered(1) on the weight specs.
    )(*args)


def init_isab_params(key, num_hiddens, ffn_num_hiddens, num_heads, num_inds):
    def linear(k, fan_in, fan_out):
        bound = 1.0 / math.sqrt(fan_in)            # PyTorch Linear default init
        return jax.random.uniform(k, (fan_in, fan_out), jnp.float32, -bound, bound)

    def mab_params(k):
        ks = jax.random.split(k, 6)
        return dict(
            wq=linear(ks[0], num_hiddens, num_hiddens),
            wk=linear(ks[1], num_hiddens, num_hiddens),
            wv=linear(ks[2], num_hiddens, num_hiddens),
            wo=linear(ks[3], num_hiddens, num_hiddens),
            ln1_g=jnp.ones((1, num_hiddens), jnp.float32),
            ln1_b=jnp.zeros((1, num_hiddens), jnp.float32),
            w1=linear(ks[4], num_hiddens, ffn_num_hiddens),
            w2=linear(ks[5], ffn_num_hiddens, num_hiddens),
            ln2_g=jnp.ones((1, num_hiddens), jnp.float32),
            ln2_b=jnp.zeros((1, num_hiddens), jnp.float32),
        )

    k1, k2, k3, k4 = jax.random.split(key, 4)
    q_bound = math.sqrt(6.0 / (num_inds + num_hiddens))   # xavier_uniform
    qm_bound = math.sqrt(6.0 / (num_inds + 1))
    return dict(
        mab_q=dict(
            q=jax.random.uniform(k1, (1, num_inds, num_hiddens), jnp.float32,
                                 -q_bound, q_bound),
            q_mult=jax.random.uniform(k2, (1, num_inds, 1), jnp.float32,
                                      -qm_bound, qm_bound),
            mab=mab_params(k3),
        ),
        mab=mab_params(k4),
        alpha_mult=jnp.ones((1,), jnp.float32),            # MAB.alpha_mult
    )


def isab_forward(X, params, num_heads, X_mult=None, valid_lens=None):
    """ISAB.forward: H = MAB_Q(X, X_mult); out = MAB(X, H, X_mult, ones*alpha)."""
    assert valid_lens is None  # TODO(synk): valid_lens masking not implemented
    B, L, D = X.shape
    q = params["mab_q"]["q"]           # (1, ni, D)  shared -> constant block
    qm = params["mab_q"]["q_mult"]     # (1, ni, 1)  shared -> constant block
    ni = q.shape[1]

    use_mult = X_mult is not None
    X_mult_t = jnp.transpose(X_mult, (0, 2, 1)) if use_mult else None   # (B, 1, L)

    # ---- MAB_Q: learnable queries attend over X (use_alpha=False) ----
    H = mab_forward(q, X, qm if use_mult else None, X_mult_t,
                    params["mab_q"]["mab"], num_heads, use_mult)

    # ---- MAB: X attends over induced points H; kv_mult = ones * alpha_mult ----
    kv2_t = (jnp.ones((1, 1, ni), jnp.float32) * params["alpha_mult"]) if use_mult else None
    return mab_forward(X, H, X_mult if use_mult else None, kv2_t,
                       params["mab"], num_heads, use_mult)


if __name__ == "__main__":
    key = jax.random.PRNGKey(0)
    B, L, D = 2, 8, 32                # batch, set size, num_hiddens
    num_heads, num_inds, FFN = 4, 4, 64

    kx, km, kp = jax.random.split(key, 3)
    X = jax.random.normal(kx, (B, L, D), jnp.float32)
    X_mult = jax.random.normal(km, (B, L, 1), jnp.float32)
    params = init_isab_params(kp, D, FFN, num_heads, num_inds)

    isab = jax.jit(functools.partial(isab_forward, num_heads=num_heads))
    out = isab(X, params, X_mult=X_mult)
    out = jax.block_until_ready(out)
    assert out.shape == (B, L, D) and out.dtype == jnp.float32
    assert bool(jnp.all(jnp.isfinite(out)))
    print("KERNEL_OK")
</pallas_src>

<mosaic_0001>
module attributes {stable_mosaic.version = 11 : i64} {
  func.func @mab_kernel(%arg0: i32, %arg1: memref<1x4x32xf32, #tpu.memory_space<vmem>>, %arg2: memref<1x8x32xf32, #tpu.memory_space<vmem>>, %arg3: memref<1x4x1xf32, #tpu.memory_space<vmem>>, %arg4: memref<1x1x8xf32, #tpu.memory_space<vmem>>, %arg5: memref<32x32xbf16, #tpu.memory_space<vmem>>, %arg6: memref<32x32xbf16, #tpu.memory_space<vmem>>, %arg7: memref<32x32xbf16, #tpu.memory_space<vmem>>, %arg8: memref<32x32xbf16, #tpu.memory_space<vmem>>, %arg9: memref<1x32xf32, #tpu.memory_space<vmem>>, %arg10: memref<1x32xf32, #tpu.memory_space<vmem>>, %arg11: memref<32x64xbf16, #tpu.memory_space<vmem>>, %arg12: memref<64x32xbf16, #tpu.memory_space<vmem>>, %arg13: memref<1x32xf32, #tpu.memory_space<vmem>>, %arg14: memref<1x32xf32, #tpu.memory_space<vmem>>, %arg15: memref<1x4x32xf32, #tpu.memory_space<vmem>>) attributes {dimension_semantics = [#tpu.dimension_semantics<parallel>], iteration_bounds = array<i64: 2>, scalar_prefetch = 0 : i64, scratch_operands = 0 : i64, tpu.core_type = #tpu.core_type<tc>, window_params = [{pipeline_mode = #tpu.pipeline_mode<synchronous>, transform_indices = @transform_0, window_bounds = array<i64: 1, 4, 32>}, {transform_indices = @transform_1, window_bounds = array<i64: 1, 8, 32>}, {pipeline_mode = #tpu.pipeline_mode<synchronous>, transform_indices = @transform_2, window_bounds = array<i64: 1, 4, 1>}, {transform_indices = @transform_3, window_bounds = array<i64: 1, 1, 8>}, {pipeline_mode = #tpu.pipeline_mode<synchronous>, transform_indices = @transform_4, window_bounds = array<i64: 32, 32>}, {pipeline_mode = #tpu.pipeline_mode<synchronous>, transform_indices = @transform_5, window_bounds = array<i64: 32, 32>}, {pipeline_mode = #tpu.pipeline_mode<synchronous>, transform_indices = @transform_6, window_bounds = array<i64: 32, 32>}, {pipeline_mode = #tpu.pipeline_mode<synchronous>, transform_indices = @transform_7, window_bounds = array<i64: 32, 32>}, {pipeline_mode = #tpu.pipeline_mode<synchronous>, transform_indices = @transform_8, window_bounds = array<i64: 1, 32>}, {pipeline_mode = #tpu.pipeline_mode<synchronous>, transform_indices = @transform_9, window_bounds = array<i64: 1, 32>}, {pipeline_mode = #tpu.pipeline_mode<synchronous>, transform_indices = @transform_10, window_bounds = array<i64: 32, 64>}, {pipeline_mode = #tpu.pipeline_mode<synchronous>, transform_indices = @transform_11, window_bounds = array<i64: 64, 32>}, {pipeline_mode = #tpu.pipeline_mode<synchronous>, transform_indices = @transform_12, window_bounds = array<i64: 1, 32>}, {pipeline_mode = #tpu.pipeline_mode<synchronous>, transform_indices = @transform_13, window_bounds = array<i64: 1, 32>}, {transform_indices = @transform_14, window_bounds = array<i64: 1, 4, 32>}]} {
    %c0 = arith.constant 0 : index
    %c0_0 = arith.constant 0 : index
    %c0_1 = arith.constant 0 : index
    %0 = vector.load %arg1[%c0, %c0_0, %c0_1] : memref<1x4x32xf32, #tpu.memory_space<vmem>>, vector<1x4x32xf32>
    %1 = vector.shape_cast %0 : vector<1x4x32xf32> to vector<4x32xf32>
    %2 = arith.truncf %1 : vector<4x32xf32> to vector<4x32xbf16>
    %c0_2 = arith.constant 0 : index
    %c0_3 = arith.constant 0 : index
    %c0_4 = arith.constant 0 : index
    %3 = vector.load %arg2[%c0_2, %c0_3, %c0_4] : memref<1x8x32xf32, #tpu.memory_space<vmem>>, vector<1x8x32xf32>
    %4 = vector.shape_cast %3 : vector<1x8x32xf32> to vector<8x32xf32>
    %5 = arith.truncf %4 : vector<8x32xf32> to vector<8x32xbf16>
    %c0_5 = arith.constant 0 : index
    %c0_6 = arith.constant 0 : index
    %6 = vector.load %arg5[%c0_5, %c0_6] : memref<32x32xbf16, #tpu.memory_space<vmem>>, vector<32x32xbf16>
    %cst = arith.constant dense<0.000000e+00> : vector<4x32xf32>
    %7 = tpu.matmul %2, %6, %cst {dimension_numbers = #tpu.dot_dimension_numbers<[1], [0], [0], [1], [0, 0, 1, 1], [], []>} : vector<4x32xbf16>, vector<32x32xbf16>, vector<4x32xf32> -> vector<4x32xf32>
    %c0_7 = arith.constant 0 : index
    %c0_8 = arith.constant 0 : index
    %8 = vector.load %arg6[%c0_7, %c0_8] : memref<32x32xbf16, #tpu.memory_space<vmem>>, vector<32x32xbf16>
    %cst_9 = arith.constant dense<0.000000e+00> : vector<8x32xf32>
    %9 = tpu.matmul %5, %8, %cst_9 {dimension_numbers = #tpu.dot_dimension_numbers<[1], [0], [0], [1], [0, 0, 1, 1], [], []>} : vector<8x32xbf16>, vector<32x32xbf16>, vector<8x32xf32> -> vector<8x32xf32>
    %c0_10 = arith.constant 0 : index
    %c0_11 = arith.constant 0 : index
    %10 = vector.load %arg7[%c0_10, %c0_11] : memref<32x32xbf16, #tpu.memory_space<vmem>>, vector<32x32xbf16>
    %cst_12 = arith.constant dense<0.000000e+00> : vector<8x32xf32>
    %11 = tpu.matmul %5, %10, %cst_12 {dimension_numbers = #tpu.dot_dimension_numbers<[1], [0], [0], [1], [0, 0, 1, 1], [], []>} : vector<8x32xbf16>, vector<32x32xbf16>, vector<8x32xf32> -> vector<8x32xf32>
    %cst_13 = arith.constant 0.353553385 : f32
    %12 = vector.broadcast %cst_13 : f32 to vector<4x32xf32>
    %13 = arith.mulf %7, %12 : vector<4x32xf32>
    %14 = arith.truncf %13 : vector<4x32xf32> to vector<4x32xbf16>
    %15 = arith.truncf %9 : vector<8x32xf32> to vector<8x32xbf16>
    %16 = arith.truncf %11 : vector<8x32xf32> to vector<8x32xbf16>
    %c0_14 = arith.constant 0 : index
    %c0_15 = arith.constant 0 : index
    %c0_16 = arith.constant 0 : index
    %17 = vector.load %arg3[%c0_14, %c0_15, %c0_16] : memref<1x4x1xf32, #tpu.memory_space<vmem>>, vector<1x4x1xf32>
    %18 = vector.shape_cast %17 : vector<1x4x1xf32> to vector<4x1xf32>
    %c0_17 = arith.constant 0 : index
    %c0_18 = arith.constant 0 : index
    %c0_19 = arith.constant 0 : index
    %19 = vector.load %arg4[%c0_17, %c0_18, %c0_19] : memref<1x1x8xf32, #tpu.memory_space<vmem>>, vector<1x1x8xf32>
    %20 = vector.shape_cast %19 : vector<1x1x8xf32> to vector<1x8xf32>
    %21 = arith.mulf %18, %18 : vector<4x1xf32>
    %22 = vector.shape_cast %21 : vector<4x1xf32> to vector<1x4x1xf32>
    %cst_20 = arith.constant dense<0.000000e+00> : vector<1xf32>
    %23 = vector.multi_reduction <add>, %22, %cst_20 [1, 2] : vector<1x4x1xf32> to vector<1xf32>
    %24 = vector.shape_cast %23 : vector<1xf32> to vector<1x1x1xf32>
    %25 = vector.extract %24[0, 0, 0] : f32 from vector<1x1x1xf32>
    %26 = vector.broadcast %25 : f32 to vector<1x1xf32>
    %27 = arith.mulf %20, %20 : vector<1x8xf32>
    %28 = vector.shape_cast %27 : vector<1x8xf32> to vector<1x1x8xf32>
    %cst_21 = arith.constant dense<0.000000e+00> : vector<1xf32>
    %29 = vector.multi_reduction <add>, %28, %cst_21 [1, 2] : vector<1x1x8xf32> to vector<1xf32>
    %30 = vector.shape_cast %29 : vector<1xf32> to vector<1x1x1xf32>
    %31 = vector.extract %30[0, 0, 0] : f32 from vector<1x1x1xf32>
    %32 = vector.broadcast %31 : f32 to vector<1x1xf32>
    %33 = arith.mulf %26, %32 : vector<1x1xf32>
    %34 = math.sqrt %33 : vector<1x1xf32>
    %cst_22 = arith.constant 9.99999974E-6 : f32
    %35 = vector.broadcast %cst_22 : f32 to vector<1x1xf32>
    %36 = arith.addf %34, %35 : vector<1x1xf32>
    %37 = tpu.reciprocal %36 {approx = true} : vector<1x1xf32> -> vector<1x1xf32>
    %38 = vector.broadcast %18 : vector<4x1xf32> to vector<4x8xf32>
    %39 = vector.broadcast %20 : vector<1x8xf32> to vector<4x8xf32>
    %40 = arith.mulf %38, %39 : vector<4x8xf32>
    %41 = vector.broadcast %37 : vector<1x1xf32> to vector<4x8xf32>
    %42 = arith.mulf %40, %41 : vector<4x8xf32>
    %cst_23 = arith.constant 0.000000e+00 : f32
    %43 = vector.broadcast %cst_23 : f32 to vector<4x32xf32>
    %44 = vector.extract_strided_slice %14 {offsets = [0, 0], sizes = [4, 8], strides = [1, 1]} : vector<4x32xbf16> to vector<4x8xbf16>
    %45 = vector.extract_strided_slice %15 {offsets = [0, 0], sizes = [8, 8], strides = [1, 1]} : vector<8x32xbf16> to vector<8x8xbf16>
    %cst_24 = arith.constant dense<0.000000e+00> : vector<4x8xf32>
    %46 = tpu.matmul %44, %45, %cst_24 {dimension_numbers = #tpu.dot_dimension_numbers<[1], [1], [0], [0], [0, 0, 1, 0], [], []>} : vector<4x8xbf16>, vector<8x8xbf16>, vector<4x8xf32> -> vector<4x8xf32>
    %cst_25 = arith.constant dense<0xFF800000> : vector<4xf32>
    %47 = vector.multi_reduction <maximumf>, %46, %cst_25 [1] : vector<4x8xf32> to vector<4xf32>
    %48 = vector.shape_cast %47 : vector<4xf32> to vector<4x1xf32>
    %49 = vector.broadcast %48 : vector<4x1xf32> to vector<4x8xf32>
    %50 = arith.subf %46, %49 : vector<4x8xf32>
    %51 = math.exp %50 : vector<4x8xf32>
    %cst_26 = arith.constant dense<0.000000e+00> : vector<4xf32>
    %52 = vector.multi_reduction <add>, %51, %cst_26 [1] : vector<4x8xf32> to vector<4xf32>
    %53 = vector.shape_cast %52 : vector<4xf32> to vector<4x1xf32>
    %54 = tpu.reciprocal %53 {approx = true} : vector<4x1xf32> -> vector<4x1xf32>
    %55 = vector.broadcast %54 : vector<4x1xf32> to vector<4x8xf32>
    %56 = arith.mulf %51, %55 : vector<4x8xf32>
    %57 = arith.addf %56, %42 : vector<4x8xf32>
    %58 = arith.truncf %57 : vector<4x8xf32> to vector<4x8xbf16>
    %59 = vector.extract_strided_slice %16 {offsets = [0, 0], sizes = [8, 8], strides = [1, 1]} : vector<8x32xbf16> to vector<8x8xbf16>
    %cst_27 = arith.constant dense<0.000000e+00> : vector<4x8xf32>
    %60 = tpu.matmul %58, %59, %cst_27 {dimension_numbers = #tpu.dot_dimension_numbers<[1], [0], [0], [1], [0, 0, 1, 1], [], []>} : vector<4x8xbf16>, vector<8x8xbf16>, vector<4x8xf32> -> vector<4x8xf32>
    %61 = arith.truncf %60 : vector<4x8xf32> to vector<4x8xbf16>
    %c0_28 = arith.constant 0 : index
    %c0_29 = arith.constant 0 : index
    %62 = vector.load %arg8[%c0_28, %c0_29] : memref<32x32xbf16, #tpu.memory_space<vmem>>, vector<8x32xbf16>
    %cst_30 = arith.constant dense<0.000000e+00> : vector<4x32xf32>
    %63 = tpu.matmul %61, %62, %cst_30 {dimension_numbers = #tpu.dot_dimension_numbers<[1], [0], [0], [1], [0, 0, 1, 1], [], []>} : vector<4x8xbf16>, vector<8x32xbf16>, vector<4x32xf32> -> vector<4x32xf32>
    %64 = arith.addf %43, %63 : vector<4x32xf32>
    %65 = vector.extract_strided_slice %14 {offsets = [0, 8], sizes = [4, 8], strides = [1, 1]} : vector<4x32xbf16> to vector<4x8xbf16>
    %66 = vector.extract_strided_slice %15 {offsets = [0, 8], sizes = [8, 8], strides = [1, 1]} : vector<8x32xbf16> to vector<8x8xbf16>
    %cst_31 = arith.constant dense<0.000000e+00> : vector<4x8xf32>
    %67 = tpu.matmul %65, %66, %cst_31 {dimension_numbers = #tpu.dot_dimension_numbers<[1], [1], [0], [0], [0, 0, 1, 0], [], []>} : vector<4x8xbf16>, vector<8x8xbf16>, vector<4x8xf32> -> vector<4x8xf32>
    %cst_32 = arith.constant dense<0xFF800000> : vector<4xf32>
    %68 = vector.multi_reduction <maximumf>, %67, %cst_32 [1] : vector<4x8xf32> to vector<4xf32>
    %69 = vector.shape_cast %68 : vector<4xf32> to vector<4x1xf32>
    %70 = vector.broadcast %69 : vector<4x1xf32> to vector<4x8xf32>
    %71 = arith.subf %67, %70 : vector<4x8xf32>
    %72 = math.exp %71 : vector<4x8xf32>
    %cst_33 = arith.constant dense<0.000000e+00> : vector<4xf32>
    %73 = vector.multi_reduction <add>, %72, %cst_33 [1] : vector<4x8xf32> to vector<4xf32>
    %74 = vector.shape_cast %73 : vector<4xf32> to vector<4x1xf32>
    %75 = tpu.reciprocal %74 {approx = true} : vector<4x1xf32> -> vector<4x1xf32>
    %76 = vector.broadcast %75 : vector<4x1xf32> to vector<4x8xf32>
    %77 = arith.mulf %72, %76 : vector<4x8xf32>
    %78 = arith.addf %77, %42 : vector<4x8xf32>
    %79 = arith.truncf %78 : vector<4x8xf32> to vector<4x8xbf16>
    %80 = vector.extract_strided_slice %16 {offsets = [0, 8], sizes = [8, 8], strides = [1, 1]} : vector<8x32xbf16> to vector<8x8xbf16>
    %cst_34 = arith.constant dense<0.000000e+00> : vector<4x8xf32>
    %81 = tpu.matmul %79, %80, %cst_34 {dimension_numbers = #tpu.dot_dimension_numbers<[1], [0], [0], [1], [0, 0, 1, 1], [], []>} : vector<4x8xbf16>, vector<8x8xbf16>, vector<4x8xf32> -> vector<4x8xf32>
    %82 = arith.truncf %81 : vector<4x8xf32> to vector<4x8xbf16>
    %c8 = arith.constant 8 : index
    %c0_35 = arith.constant 0 : index
    %83 = vector.load %arg8[%c8, %c0_35] : memref<32x32xbf16, #tpu.memory_space<vmem>>, vector<8x32xbf16>
    %cst_36 = arith.constant dense<0.000000e+00> : vector<4x32xf32>
    %84 = tpu.matmul %82, %83, %cst_36 {dimension_numbers = #tpu.dot_dimension_numbers<[1], [0], [0], [1], [0, 0, 1, 1], [], []>} : vector<4x8xbf16>, vector<8x32xbf16>, vector<4x32xf32> -> vector<4x32xf32>
    %85 = arith.addf %64, %84 : vector<4x32xf32>
    %86 = vector.extract_strided_slice %14 {offsets = [0, 16], sizes = [4, 8], strides = [1, 1]} : vector<4x32xbf16> to vector<4x8xbf16>
    %87 = vector.extract_strided_slice %15 {offsets = [0, 16], sizes = [8, 8], strides = [1, 1]} : vector<8x32xbf16> to vector<8x8xbf16>
    %cst_37 = arith.constant dense<0.000000e+00> : vector<4x8xf32>
    %88 = tpu.matmul %86, %87, %cst_37 {dimension_numbers = #tpu.dot_dimension_numbers<[1], [1], [0], [0], [0, 0, 1, 0], [], []>} : vector<4x8xbf16>, vector<8x8xbf16>, vector<4x8xf32> -> vector<4x8xf32>
    %cst_38 = arith.constant dense<0xFF800000> : vector<4xf32>
    %89 = vector.multi_reduction <maximumf>, %88, %cst_38 [1] : vector<4x8xf32> to vector<4xf32>
    %90 = vector.shape_cast %89 : vector<4xf32> to vector<4x1xf32>
    %91 = vector.broadcast %90 : vector<4x1xf32> to vector<4x8xf32>
    %92 = arith.subf %88, %91 : vector<4x8xf32>
    %93 = math.exp %92 : vector<4x8xf32>
    %cst_39 = arith.constant dense<0.000000e+00> : vector<4xf32>
    %94 = vector.multi_reduction <add>, %93, %cst_39 [1] : vector<4x8xf32> to vector<4xf32>
    %95 = vector.shape_cast %94 : vector<4xf32> to vector<4x1xf32>
    %96 = tpu.reciprocal %95 {approx = true} : vector<4x1xf32> -> vector<4x1xf32>
    %97 = vector.broadcast %96 : vector<4x1xf32> to vector<4x8xf32>
    %98 = arith.mulf %93, %97 : vector<4x8xf32>
    %99 = arith.addf %98, %42 : vector<4x8xf32>
    %100 = arith.truncf %99 : vector<4x8xf32> to vector<4x8xbf16>
    %101 = vector.extract_strided_slice %16 {offsets = [0, 16], sizes = [8, 8], strides = [1, 1]} : vector<8x32xbf16> to vector<8x8xbf16>
    %cst_40 = arith.constant dense<0.000000e+00> : vector<4x8xf32>
    %102 = tpu.matmul %100, %101, %cst_40 {dimension_numbers = #tpu.dot_dimension_numbers<[1], [0], [0], [1], [0, 0, 1, 1], [], []>} : vector<4x8xbf16>, vector<8x8xbf16>, vector<4x8xf32> -> vector<4x8xf32>
    %103 = arith.truncf %102 : vector<4x8xf32> to vector<4x8xbf16>
    %c16 = arith.constant 16 : index
    %c0_41 = arith.constant 0 : index
    %104 = vector.load %arg8[%c16, %c0_41] : memref<32x32xbf16, #tpu.memory_space<vmem>>, vector<8x32xbf16>
    %cst_42 = arith.constant dense<0.000000e+00> : vector<4x32xf32>
    %105 = tpu.matmul %103, %104, %cst_42 {dimension_numbers = #tpu.dot_dimension_numbers<[1], [0], [0], [1], [0, 0, 1, 1], [], []>} : vector<4x8xbf16>, vector<8x32xbf16>, vector<4x32xf32> -> vector<4x32xf32>
    %106 = arith.addf %85, %105 : vector<4x32xf32>
    %107 = vector.extract_strided_slice %14 {offsets = [0, 24], sizes = [4, 8], strides = [1, 1]} : vector<4x32xbf16> to vector<4x8xbf16>
    %108 = vector.extract_strided_slice %15 {offsets = [0, 24], sizes = [8, 8], strides = [1, 1]} : vector<8x32xbf16> to vector<8x8xbf16>
    %cst_43 = arith.constant dense<0.000000e+00> : vector<4x8xf32>
    %109 = tpu.matmul %107, %108, %cst_43 {dimension_numbers = #tpu.dot_dimension_numbers<[1], [1], [0], [0], [0, 0, 1, 0], [], []>} : vector<4x8xbf16>, vector<8x8xbf16>, vector<4x8xf32> -> vector<4x8xf32>
    %cst_44 = arith.constant dense<0xFF800000> : vector<4xf32>
    %110 = vector.multi_reduction <maximumf>, %109, %cst_44 [1] : vector<4x8xf32> to vector<4xf32>
    %111 = vector.shape_cast %110 : vector<4xf32> to vector<4x1xf32>
    %112 = vector.broadcast %111 : vector<4x1xf32> to vector<4x8xf32>
    %113 = arith.subf %109, %112 : vector<4x8xf32>
    %114 = math.exp %113 : vector<4x8xf32>
    %cst_45 = arith.constant dense<0.000000e+00> : vector<4xf32>
    %115 = vector.multi_reduction <add>, %114, %cst_45 [1] : vector<4x8xf32> to vector<4xf32>
    %116 = vector.shape_cast %115 : vector<4xf32> to vector<4x1xf32>
    %117 = tpu.reciprocal %116 {approx = true} : vector<4x1xf32> -> vector<4x1xf32>
    %118 = vector.broadcast %117 : vector<4x1xf32> to vector<4x8xf32>
    %119 = arith.mulf %114, %118 : vector<4x8xf32>
    %120 = arith.addf %119, %42 : vector<4x8xf32>
    %121 = arith.truncf %120 : vector<4x8xf32> to vector<4x8xbf16>
    %122 = vector.extract_strided_slice %16 {offsets = [0, 24], sizes = [8, 8], strides = [1, 1]} : vector<8x32xbf16> to vector<8x8xbf16>
    %cst_46 = arith.constant dense<0.000000e+00> : vector<4x8xf32>
    %123 = tpu.matmul %121, %122, %cst_46 {dimension_numbers = #tpu.dot_dimension_numbers<[1], [0], [0], [1], [0, 0, 1, 1], [], []>} : vector<4x8xbf16>, vector<8x8xbf16>, vector<4x8xf32> -> vector<4x8xf32>
    %124 = arith.truncf %123 : vector<4x8xf32> to vector<4x8xbf16>
    %c24 = arith.constant 24 : index
    %c0_47 = arith.constant 0 : index
    %125 = vector.load %arg8[%c24, %c0_47] : memref<32x32xbf16, #tpu.memory_space<vmem>>, vector<8x32xbf16>
    %cst_48 = arith.constant dense<0.000000e+00> : vector<4x32xf32>
    %126 = tpu.matmul %124, %125, %cst_48 {dimension_numbers = #tpu.dot_dimension_numbers<[1], [0], [0], [1], [0, 0, 1, 1], [], []>} : vector<4x8xbf16>, vector<8x32xbf16>, vector<4x32xf32> -> vector<4x32xf32>
    %127 = arith.addf %106, %126 : vector<4x32xf32>
    %128 = arith.addf %127, %7 : vector<4x32xf32>
    %c0_49 = arith.constant 0 : index
    %c0_50 = arith.constant 0 : index
    %129 = vector.load %arg9[%c0_49, %c0_50] : memref<1x32xf32, #tpu.memory_space<vmem>>, vector<1x32xf32>
    %c0_51 = arith.constant 0 : index
    %c0_52 = arith.constant 0 : index
    %130 = vector.load %arg10[%c0_51, %c0_52] : memref<1x32xf32, #tpu.memory_space<vmem>>, vector<1x32xf32>
    %cst_53 = arith.constant dense<0.000000e+00> : vector<4xf32>
    %131 = vector.multi_reduction <add>, %128, %cst_53 [1] : vector<4x32xf32> to vector<4xf32>
    %132 = vector.shape_cast %131 : vector<4xf32> to vector<4x1xf32>
    %cst_54 = arith.constant 3.200000e+01 : f32
    %133 = vector.broadcast %cst_54 : f32 to vector<4x1xf32>
    %134 = arith.divf %132, %133 : vector<4x1xf32>
    %135 = vector.broadcast %134 : vector<4x1xf32> to vector<4x32xf32>
    %136 = arith.subf %128, %135 : vector<4x32xf32>
    %137 = arith.mulf %136, %136 : vector<4x32xf32>
    %cst_55 = arith.constant dense<0.000000e+00> : vector<4xf32>
    %138 = vector.multi_reduction <add>, %137, %cst_55 [1] : vector<4x32xf32> to vector<4xf32>
    %139 = vector.shape_cast %138 : vector<4xf32> to vector<4x1xf32>
    %cst_56 = arith.constant 3.200000e+01 : f32
    %140 = vector.broadcast %cst_56 : f32 to vector<4x1xf32>
    %141 = arith.divf %139, %140 : vector<4x1xf32>
    %142 = vector.broadcast %134 : vector<4x1xf32> to vector<4x32xf32>
    %143 = arith.subf %128, %142 : vector<4x32xf32>
    %cst_57 = arith.constant 9.99999974E-6 : f32
    %144 = vector.broadcast %cst_57 : f32 to vector<4x1xf32>
    %145 = arith.addf %141, %144 : vector<4x1xf32>
    %146 = math.rsqrt %145 : vector<4x1xf32>
    %147 = vector.broadcast %146 : vector<4x1xf32> to vector<4x32xf32>
    %148 = arith.mulf %143, %147 : vector<4x32xf32>
    %149 = vector.broadcast %129 : vector<1x32xf32> to vector<4x32xf32>
    %150 = arith.mulf %148, %149 : vector<4x32xf32>
    %151 = vector.broadcast %130 : vector<1x32xf32> to vector<4x32xf32>
    %152 = arith.addf %150, %151 : vector<4x32xf32>
    %153 = arith.truncf %152 : vector<4x32xf32> to vector<4x32xbf16>
    %c0_58 = arith.constant 0 : index
    %c0_59 = arith.constant 0 : index
    %154 = vector.load %arg11[%c0_58, %c0_59] : memref<32x64xbf16, #tpu.memory_space<vmem>>, vector<32x64xbf16>
    %cst_60 = arith.constant dense<0.000000e+00> : vector<4x64xf32>
    %155 = tpu.matmul %153, %154, %cst_60 {dimension_numbers = #tpu.dot_dimension_numbers<[1], [0], [0], [1], [0, 0, 1, 1], [], []>} : vector<4x32xbf16>, vector<32x64xbf16>, vector<4x64xf32> -> vector<4x64xf32>
    %cst_61 = arith.constant 0.000000e+00 : f32
    %156 = vector.broadcast %cst_61 : f32 to vector<4x64xf32>
    %157 = arith.maximumf %155, %156 : vector<4x64xf32>
    %158 = arith.truncf %157 : vector<4x64xf32> to vector<4x64xbf16>
    %c0_62 = arith.constant 0 : index
    %c0_63 = arith.constant 0 : index
    %159 = vector.load %arg12[%c0_62, %c0_63] : memref<64x32xbf16, #tpu.memory_space<vmem>>, vector<64x32xbf16>
    %cst_64 = arith.constant dense<0.000000e+00> : vector<4x32xf32>
    %160 = tpu.matmul %158, %159, %cst_64 {dimension_numbers = #tpu.dot_dimension_numbers<[1], [0], [0], [1], [0, 0, 1, 1], [], []>} : vector<4x64xbf16>, vector<64x32xbf16>, vector<4x32xf32> -> vector<4x32xf32>
    %161 = arith.addf %160, %152 : vector<4x32xf32>
    %c0_65 = arith.constant 0 : index
    %c0_66 = arith.constant 0 : index
    %162 = vector.load %arg13[%c0_65, %c0_66] : memref<1x32xf32, #tpu.memory_space<vmem>>, vector<1x32xf32>
    %c0_67 = arith.constant 0 : index
    %c0_68 = arith.constant 0 : index
    %163 = vector.load %arg14[%c0_67, %c0_68] : memref<1x32xf32, #tpu.memory_space<vmem>>, vector<1x32xf32>
    %cst_69 = arith.constant dense<0.000000e+00> : vector<4xf32>
    %164 = vector.multi_reduction <add>, %161, %cst_69 [1] : vector<4x32xf32> to vector<4xf32>
    %165 = vector.shape_cast %164 : vector<4xf32> to vector<4x1xf32>
    %cst_70 = arith.constant 3.200000e+01 : f32
    %166 = vector.broadcast %cst_70 : f32 to vector<4x1xf32>
    %167 = arith.divf %165, %166 : vector<4x1xf32>
    %168 = vector.broadcast %167 : vector<4x1xf32> to vector<4x32xf32>
    %169 = arith.subf %161, %168 : vector<4x32xf32>
    %170 = arith.mulf %169, %169 : vector<4x32xf32>
    %cst_71 = arith.constant dense<0.000000e+00> : vector<4xf32>
    %171 = vector.multi_reduction <add>, %170, %cst_71 [1] : vector<4x32xf32> to vector<4xf32>
    %172 = vector.shape_cast %171 : vector<4xf32> to vector<4x1xf32>
    %cst_72 = arith.constant 3.200000e+01 : f32
    %173 = vector.broadcast %cst_72 : f32 to vector<4x1xf32>
    %174 = arith.divf %172, %173 : vector<4x1xf32>
    %175 = vector.broadcast %167 : vector<4x1xf32> to vector<4x32xf32>
    %176 = arith.subf %161, %175 : vector<4x32xf32>
    %cst_73 = arith.constant 9.99999974E-6 : f32
    %177 = vector.broadcast %cst_73 : f32 to vector<4x1xf32>
    %178 = arith.addf %174, %177 : vector<4x1xf32>
    %179 = math.rsqrt %178 : vector<4x1xf32>
    %180 = vector.broadcast %179 : vector<4x1xf32> to vector<4x32xf32>
    %181 = arith.mulf %176, %180 : vector<4x32xf32>
    %182 = vector.broadcast %162 : vector<1x32xf32> to vector<4x32xf32>
    %183 = arith.mulf %181, %182 : vector<4x32xf32>
    %184 = vector.broadcast %163 : vector<1x32xf32> to vector<4x32xf32>
    %185 = arith.addf %183, %184 : vector<4x32xf32>
    %186 = vector.shape_cast %185 : vector<4x32xf32> to vector<1x4x32xf32>
    %c0_74 = arith.constant 0 : index
    %c0_75 = arith.constant 0 : index
    %c0_76 = arith.constant 0 : index
    %187 = vector.load %arg15[%c0_74, %c0_75, %c0_76] : memref<1x4x32xf32, #tpu.memory_space<vmem>>, vector<1x4x32xf32>
    tpu.vector_store %arg15[%c0_74, %c0_75, %c0_76], %186 {strides = array<i32>} : memref<1x4x32xf32, #tpu.memory_space<vmem>>, vector<1x4x32xf32>,
    return
  }
  func.func @transform_0(%arg0: i32) -> (i32, i32, i32) {
    %c0_i32 = arith.constant 0 : i32
    %c0_i32_0 = arith.constant 0 : i32
    %c0_i32_1 = arith.constant 0 : i32
    %c0_i32_2 = arith.constant 0 : i32
    return %c0_i32, %c0_i32_0, %c0_i32_1 : i32, i32, i32
  }
  func.func @transform_1(%arg0: i32) -> (i32, i32, i32) {
    %c0_i32 = arith.constant 0 : i32
    %c0_i32_0 = arith.constant 0 : i32
    %c0_i32_1 = arith.constant 0 : i32
    return %arg0, %c0_i32, %c0_i32_0 : i32, i32, i32
  }
  func.func @transform_2(%arg0: i32) -> (i32, i32, i32) {
    %c0_i32 = arith.constant 0 : i32
    %c0_i32_0 = arith.constant 0 : i32
    %c0_i32_1 = arith.constant 0 : i32
    %c0_i32_2 = arith.constant 0 : i32
    return %c0_i32, %c0_i32_0, %c0_i32_1 : i32, i32, i32
  }
  func.func @transform_3(%arg0: i32) -> (i32, i32, i32) {
    %c0_i32 = arith.constant 0 : i32
    %c0_i32_0 = arith.constant 0 : i32
    %c0_i32_1 = arith.constant 0 : i32
    return %arg0, %c0_i32, %c0_i32_0 : i32, i32, i32
  }
  func.func @transform_4(%arg0: i32) -> (i32, i32) {
    %c0_i32 = arith.constant 0 : i32
    %c0_i32_0 = arith.constant 0 : i32
    %c0_i32_1 = arith.constant 0 : i32
    return %c0_i32, %c0_i32_0 : i32, i32
  }
  func.func @transform_5(%arg0: i32) -> (i32, i32) {
    %c0_i32 = arith.constant 0 : i32
    %c0_i32_0 = arith.constant 0 : i32
    %c0_i32_1 = arith.constant 0 : i32
    return %c0_i32, %c0_i32_0 : i32, i32
  }
  func.func @transform_6(%arg0: i32) -> (i32, i32) {
    %c0_i32 = arith.constant 0 : i32
    %c0_i32_0 = arith.constant 0 : i32
    %c0_i32_1 = arith.constant 0 : i32
    return %c0_i32, %c0_i32_0 : i32, i32
  }
  func.func @transform_7(%arg0: i32) -> (i32, i32) {
    %c0_i32 = arith.constant 0 : i32
    %c0_i32_0 = arith.constant 0 : i32
    %c0_i32_1 = arith.constant 0 : i32
    return %c0_i32, %c0_i32_0 : i32, i32
  }
  func.func @transform_8(%arg0: i32) -> (i32, i32) {
    %c0_i32 = arith.constant 0 : i32
    %c0_i32_0 = arith.constant 0 : i32
    %c0_i32_1 = arith.constant 0 : i32
    return %c0_i32, %c0_i32_0 : i32, i32
  }
  func.func @transform_9(%arg0: i32) -> (i32, i32) {
    %c0_i32 = arith.constant 0 : i32
    %c0_i32_0 = arith.constant 0 : i32
    %c0_i32_1 = arith.constant 0 : i32
    return %c0_i32, %c0_i32_0 : i32, i32
  }
  func.func @transform_10(%arg0: i32) -> (i32, i32) {
    %c0_i32 = arith.constant 0 : i32
    %c0_i32_0 = arith.constant 0 : i32
    %c0_i32_1 = arith.constant 0 : i32
    return %c0_i32, %c0_i32_0 : i32, i32
  }
  func.func @transform_11(%arg0: i32) -> (i32, i32) {
    %c0_i32 = arith.constant 0 : i32
    %c0_i32_0 = arith.constant 0 : i32
    %c0_i32_1 = arith.constant 0 : i32
    return %c0_i32, %c0_i32_0 : i32, i32
  }
  func.func @transform_12(%arg0: i32) -> (i32, i32) {
    %c0_i32 = arith.constant 0 : i32
    %c0_i32_0 = arith.constant 0 : i32
    %c0_i32_1 = arith.constant 0 : i32
    return %c0_i32, %c0_i32_0 : i32, i32
  }
  func.func @transform_13(%arg0: i32) -> (i32, i32) {
    %c0_i32 = arith.constant 0 : i32
    %c0_i32_0 = arith.constant 0 : i32
    %c0_i32_1 = arith.constant 0 : i32
    return %c0_i32, %c0_i32_0 : i32, i32
  }
  func.func @transform_14(%arg0: i32) -> (i32, i32, i32) {
    %c0_i32 = arith.constant 0 : i32
    %c0_i32_0 = arith.constant 0 : i32
    %c0_i32_1 = arith.constant 0 : i32
    return %arg0, %c0_i32, %c0_i32_0 : i32, i32, i32
  }
}

module attributes {stable_mosaic.version = 11 : i64} {
  func.func @mab_kernel(%arg0: i32, %arg1: memref<1x8x32xf32, #tpu.memory_space<vmem>>, %arg2: memref<1x4x32xf32, #tpu.memory_space<vmem>>, %arg3: memref<1x8x1xf32, #tpu.memory_space<vmem>>, %arg4: memref<1x1x4xf32, #tpu.memory_space<vmem>>, %arg5: memref<32x32xbf16, #tpu.memory_space<vmem>>, %arg6: memref<32x32xbf16, #tpu.memory_space<vmem>>, %arg7: memref<32x32xbf16, #tpu.memory_space<vmem>>, %arg8: memref<32x32xbf16, #tpu.memory_space<vmem>>, %arg9: memref<1x32xf32, #tpu.memory_space<vmem>>, %arg10: memref<1x32xf32, #tpu.memory_space<vmem>>, %arg11: memref<32x64xbf16, #tpu.memory_space<vmem>>, %arg12: memref<64x32xbf16, #tpu.memory_space<vmem>>, %arg13: memref<1x32xf32, #tpu.memory_space<vmem>>, %arg14: memref<1x32xf32, #tpu.memory_space<vmem>>, %arg15: memref<1x8x32xf32, #tpu.memory_space<vmem>>) attributes {dimension_semantics = [#tpu.dimension_semantics<parallel>], iteration_bounds = array<i64: 2>, scalar_prefetch = 0 : i64, scratch_operands = 0 : i64, tpu.core_type = #tpu.core_type<tc>, window_params = [{transform_indices = @transform_0, window_bounds = array<i64: 1, 8, 32>}, {transform_indices = @transform_1, window_bounds = array<i64: 1, 4, 32>}, {transform_indices = @transform_2, window_bounds = array<i64: 1, 8, 1>}, {pipeline_mode = #tpu.pipeline_mode<synchronous>, transform_indices = @transform_3, window_bounds = array<i64: 1, 1, 4>}, {pipeline_mode = #tpu.pipeline_mode<synchronous>, transform_indices = @transform_4, window_bounds = array<i64: 32, 32>}, {pipeline_mode = #tpu.pipeline_mode<synchronous>, transform_indices = @transform_5, window_bounds = array<i64: 32, 32>}, {pipeline_mode = #tpu.pipeline_mode<synchronous>, transform_indices = @transform_6, window_bounds = array<i64: 32, 32>}, {pipeline_mode = #tpu.pipeline_mode<synchronous>, transform_indices = @transform_7, window_bounds = array<i64: 32, 32>}, {pipeline_mode = #tpu.pipeline_mode<synchronous>, transform_indices = @transform_8, window_bounds = array<i64: 1, 32>}, {pipeline_mode = #tpu.pipeline_mode<synchronous>, transform_indices = @transform_9, window_bounds = array<i64: 1, 32>}, {pipeline_mode = #tpu.pipeline_mode<synchronous>, transform_indices = @transform_10, window_bounds = array<i64: 32, 64>}, {pipeline_mode = #tpu.pipeline_mode<synchronous>, transform_indices = @transform_11, window_bounds = array<i64: 64, 32>}, {pipeline_mode = #tpu.pipeline_mode<synchronous>, transform_indices = @transform_12, window_bounds = array<i64: 1, 32>}, {pipeline_mode = #tpu.pipeline_mode<synchronous>, transform_indices = @transform_13, window_bounds = array<i64: 1, 32>}, {transform_indices = @transform_14, window_bounds = array<i64: 1, 8, 32>}]} {
    %c0 = arith.constant 0 : index
    %c0_0 = arith.constant 0 : index
    %c0_1 = arith.constant 0 : index
    %0 = vector.load %arg1[%c0, %c0_0, %c0_1] : memref<1x8x32xf32, #tpu.memory_space<vmem>>, vector<1x8x32xf32>
    %1 = vector.shape_cast %0 : vector<1x8x32xf32> to vector<8x32xf32>
    %2 = arith.truncf %1 : vector<8x32xf32> to vector<8x32xbf16>
    %c0_2 = arith.constant 0 : index
    %c0_3 = arith.constant 0 : index
    %c0_4 = arith.constant 0 : index
    %3 = vector.load %arg2[%c0_2, %c0_3, %c0_4] : memref<1x4x32xf32, #tpu.memory_space<vmem>>, vector<1x4x32xf32>
    %4 = vector.shape_cast %3 : vector<1x4x32xf32> to vector<4x32xf32>
    %5 = arith.truncf %4 : vector<4x32xf32> to vector<4x32xbf16>
    %c0_5 = arith.constant 0 : index
    %c0_6 = arith.constant 0 : index
    %6 = vector.load %arg5[%c0_5, %c0_6] : memref<32x32xbf16, #tpu.memory_space<vmem>>, vector<32x32xbf16>
    %cst = arith.constant dense<0.000000e+00> : vector<8x32xf32>
    %7 = tpu.matmul %2, %6, %cst {dimension_numbers = #tpu.dot_dimension_numbers<[1], [0], [0], [1], [0, 0, 1, 1], [], []>} : vector<8x32xbf16>, vector<32x32xbf16>, vector<8x32xf32> -> vector<8x32xf32>
    %c0_7 = arith.constant 0 : index
    %c0_8 = arith.constant 0 : index
    %8 = vector.load %arg6[%c0_7, %c0_8] : memref<32x32xbf16, #tpu.memory_space<vmem>>, vector<32x32xbf16>
    %cst_9 = arith.constant dense<0.000000e+00> : vector<4x32xf32>
    %9 = tpu.matmul %5, %8, %cst_9 {dimension_numbers = #tpu.dot_dimension_numbers<[1], [0], [0], [1], [0, 0, 1, 1], [], []>} : vector<4x32xbf16>, vector<32x32xbf16>, vector<4x32xf32> -> vector<4x32xf32>
    %c0_10 = arith.constant 0 : index
    %c0_11 = arith.constant 0 : index
    %10 = vector.load %arg7[%c0_10, %c0_11] : memref<32x32xbf16, #tpu.memory_space<vmem>>, vector<32x32xbf16>
    %cst_12 = arith.constant dense<0.000000e+00> : vector<4x32xf32>
    %11 = tpu.matmul %5, %10, %cst_12 {dimension_numbers = #tpu.dot_dimension_numbers<[1], [0], [0], [1], [0, 0, 1, 1], [], []>} : vector<4x32xbf16>, vector<32x32xbf16>, vector<4x32xf32> -> vector<4x32xf32>
    %cst_13 = arith.constant 0.353553385 : f32
    %12 = vector.broadcast %cst_13 : f32 to vector<8x32xf32>
    %13 = arith.mulf %7, %12 : vector<8x32xf32>
    %14 = arith.truncf %13 : vector<8x32xf32> to vector<8x32xbf16>
    %15 = arith.truncf %9 : vector<4x32xf32> to vector<4x32xbf16>
    %16 = arith.truncf %11 : vector<4x32xf32> to vector<4x32xbf16>
    %c0_14 = arith.constant 0 : index
    %c0_15 = arith.constant 0 : index
    %c0_16 = arith.constant 0 : index
    %17 = vector.load %arg3[%c0_14, %c0_15, %c0_16] : memref<1x8x1xf32, #tpu.memory_space<vmem>>, vector<1x8x1xf32>
    %18 = vector.shape_cast %17 : vector<1x8x1xf32> to vector<8x1xf32>
    %c0_17 = arith.constant 0 : index
    %c0_18 = arith.constant 0 : index
    %c0_19 = arith.constant 0 : index
    %19 = vector.load %arg4[%c0_17, %c0_18, %c0_19] : memref<1x1x4xf32, #tpu.memory_space<vmem>>, vector<1x1x4xf32>
    %20 = vector.shape_cast %19 : vector<1x1x4xf32> to vector<1x4xf32>
    %21 = arith.mulf %18, %18 : vector<8x1xf32>
    %22 = vector.shape_cast %21 : vector<8x1xf32> to vector<1x8x1xf32>
    %cst_20 = arith.constant dense<0.000000e+00> : vector<1xf32>
    %23 = vector.multi_reduction <add>, %22, %cst_20 [1, 2] : vector<1x8x1xf32> to vector<1xf32>
    %24 = vector.shape_cast %23 : vector<1xf32> to vector<1x1x1xf32>
    %25 = vector.extract %24[0, 0, 0] : f32 from vector<1x1x1xf32>
    %26 = vector.broadcast %25 : f32 to vector<1x1xf32>
    %27 = arith.mulf %20, %20 : vector<1x4xf32>
    %28 = vector.shape_cast %27 : vector<1x4xf32> to vector<1x1x4xf32>
    %cst_21 = arith.constant dense<0.000000e+00> : vector<1xf32>
    %29 = vector.multi_reduction <add>, %28, %cst_21 [1, 2] : vector<1x1x4xf32> to vector<1xf32>
    %30 = vector.shape_cast %29 : vector<1xf32> to vector<1x1x1xf32>
    %31 = vector.extract %30[0, 0, 0] : f32 from vector<1x1x1xf32>
    %32 = vector.broadcast %31 : f32 to vector<1x1xf32>
    %33 = arith.mulf %26, %32 : vector<1x1xf32>
    %34 = math.sqrt %33 : vector<1x1xf32>
    %cst_22 = arith.constant 9.99999974E-6 : f32
    %35 = vector.broadcast %cst_22 : f32 to vector<1x1xf32>
    %36 = arith.addf %34, %35 : vector<1x1xf32>
    %37 = tpu.reciprocal %36 {approx = true} : vector<1x1xf32> -> vector<1x1xf32>
    %38 = vector.broadcast %18 : vector<8x1xf32> to vector<8x4xf32>
    %39 = vector.broadcast %20 : vector<1x4xf32> to vector<8x4xf32>
    %40 = arith.mulf %38, %39 : vector<8x4xf32>
    %41 = vector.broadcast %37 : vector<1x1xf32> to vector<8x4xf32>
    %42 = arith.mulf %40, %41 : vector<8x4xf32>
    %cst_23 = arith.constant 0.000000e+00 : f32
    %43 = vector.broadcast %cst_23 : f32 to vector<8x32xf32>
    %44 = vector.extract_strided_slice %14 {offsets = [0, 0], sizes = [8, 8], strides = [1, 1]} : vector<8x32xbf16> to vector<8x8xbf16>
    %45 = vector.extract_strided_slice %15 {offsets = [0, 0], sizes = [4, 8], strides = [1, 1]} : vector<4x32xbf16> to vector<4x8xbf16>
    %cst_24 = arith.constant dense<0.000000e+00> : vector<8x4xf32>
    %46 = tpu.matmul %44, %45, %cst_24 {dimension_numbers = #tpu.dot_dimension_numbers<[1], [1], [0], [0], [0, 0, 1, 0], [], []>} : vector<8x8xbf16>, vector<4x8xbf16>, vector<8x4xf32> -> vector<8x4xf32>
    %cst_25 = arith.constant dense<0xFF800000> : vector<8xf32>
    %47 = vector.multi_reduction <maximumf>, %46, %cst_25 [1] : vector<8x4xf32> to vector<8xf32>
    %48 = vector.shape_cast %47 : vector<8xf32> to vector<8x1xf32>
    %49 = vector.broadcast %48 : vector<8x1xf32> to vector<8x4xf32>
    %50 = arith.subf %46, %49 : vector<8x4xf32>
    %51 = math.exp %50 : vector<8x4xf32>
    %cst_26 = arith.constant dense<0.000000e+00> : vector<8xf32>
    %52 = vector.multi_reduction <add>, %51, %cst_26 [1] : vector<8x4xf32> to vector<8xf32>
    %53 = vector.shape_cast %52 : vector<8xf32> to vector<8x1xf32>
    %54 = tpu.reciprocal %53 {approx = true} : vector<8x1xf32> -> vector<8x1xf32>
    %55 = vector.broadcast %54 : vector<8x1xf32> to vector<8x4xf32>
    %56 = arith.mulf %51, %55 : vector<8x4xf32>
    %57 = arith.addf %56, %42 : vector<8x4xf32>
    %58 = arith.truncf %57 : vector<8x4xf32> to vector<8x4xbf16>
    %59 = vector.extract_strided_slice %16 {offsets = [0, 0], sizes = [4, 8], strides = [1, 1]} : vector<4x32xbf16> to vector<4x8xbf16>
    %cst_27 = arith.constant dense<0.000000e+00> : vector<8x8xf32>
    %60 = tpu.matmul %58, %59, %cst_27 {dimension_numbers = #tpu.dot_dimension_numbers<[1], [0], [0], [1], [0, 0, 1, 1], [], []>} : vector<8x4xbf16>, vector<4x8xbf16>, vector<8x8xf32> -> vector<8x8xf32>
    %61 = arith.truncf %60 : vector<8x8xf32> to vector<8x8xbf16>
    %c0_28 = arith.constant 0 : index
    %c0_29 = arith.constant 0 : index
    %62 = vector.load %arg8[%c0_28, %c0_29] : memref<32x32xbf16, #tpu.memory_space<vmem>>, vector<8x32xbf16>
    %cst_30 = arith.constant dense<0.000000e+00> : vector<8x32xf32>
    %63 = tpu.matmul %61, %62, %cst_30 {dimension_numbers = #tpu.dot_dimension_numbers<[1], [0], [0], [1], [0, 0, 1, 1], [], []>} : vector<8x8xbf16>, vector<8x32xbf16>, vector<8x32xf32> -> vector<8x32xf32>
    %64 = arith.addf %43, %63 : vector<8x32xf32>
    %65 = vector.extract_strided_slice %14 {offsets = [0, 8], sizes = [8, 8], strides = [1, 1]} : vector<8x32xbf16> to vector<8x8xbf16>
    %66 = vector.extract_strided_slice %15 {offsets = [0, 8], sizes = [4, 8], strides = [1, 1]} : vector<4x32xbf16> to vector<4x8xbf16>
    %cst_31 = arith.constant dense<0.000000e+00> : vector<8x4xf32>
    %67 = tpu.matmul %65, %66, %cst_31 {dimension_numbers = #tpu.dot_dimension_numbers<[1], [1], [0], [0], [0, 0, 1, 0], [], []>} : vector<8x8xbf16>, vector<4x8xbf16>, vector<8x4xf32> -> vector<8x4xf32>
    %cst_32 = arith.constant dense<0xFF800000> : vector<8xf32>
    %68 = vector.multi_reduction <maximumf>, %67, %cst_32 [1] : vector<8x4xf32> to vector<8xf32>
    %69 = vector.shape_cast %68 : vector<8xf32> to vector<8x1xf32>
    %70 = vector.broadcast %69 : vector<8x1xf32> to vector<8x4xf32>
    %71 = arith.subf %67, %70 : vector<8x4xf32>
    %72 = math.exp %71 : vector<8x4xf32>
    %cst_33 = arith.constant dense<0.000000e+00> : vector<8xf32>
    %73 = vector.multi_reduction <add>, %72, %cst_33 [1] : vector<8x4xf32> to vector<8xf32>
    %74 = vector.shape_cast %73 : vector<8xf32> to vector<8x1xf32>
    %75 = tpu.reciprocal %74 {approx = true} : vector<8x1xf32> -> vector<8x1xf32>
    %76 = vector.broadcast %75 : vector<8x1xf32> to vector<8x4xf32>
    %77 = arith.mulf %72, %76 : vector<8x4xf32>
    %78 = arith.addf %77, %42 : vector<8x4xf32>
    %79 = arith.truncf %78 : vector<8x4xf32> to vector<8x4xbf16>
    %80 = vector.extract_strided_slice %16 {offsets = [0, 8], sizes = [4, 8], strides = [1, 1]} : vector<4x32xbf16> to vector<4x8xbf16>
    %cst_34 = arith.constant dense<0.000000e+00> : vector<8x8xf32>
    %81 = tpu.matmul %79, %80, %cst_34 {dimension_numbers = #tpu.dot_dimension_numbers<[1], [0], [0], [1], [0, 0, 1, 1], [], []>} : vector<8x4xbf16>, vector<4x8xbf16>, vector<8x8xf32> -> vector<8x8xf32>
    %82 = arith.truncf %81 : vector<8x8xf32> to vector<8x8xbf16>
    %c8 = arith.constant 8 : index
    %c0_35 = arith.constant 0 : index
    %83 = vector.load %arg8[%c8, %c0_35] : memref<32x32xbf16, #tpu.memory_space<vmem>>, vector<8x32xbf16>
    %cst_36 = arith.constant dense<0.000000e+00> : vector<8x32xf32>
    %84 = tpu.matmul %82, %83, %cst_36 {dimension_numbers = #tpu.dot_dimension_numbers<[1], [0], [0], [1], [0, 0, 1, 1], [], []>} : vector<8x8xbf16>, vector<8x32xbf16>, vector<8x32xf32> -> vector<8x32xf32>
    %85 = arith.addf %64, %84 : vector<8x32xf32>
    %86 = vector.extract_strided_slice %14 {offsets = [0, 16], sizes = [8, 8], strides = [1, 1]} : vector<8x32xbf16> to vector<8x8xbf16>
    %87 = vector.extract_strided_slice %15 {offsets = [0, 16], sizes = [4, 8], strides = [1, 1]} : vector<4x32xbf16> to vector<4x8xbf16>
    %cst_37 = arith.constant dense<0.000000e+00> : vector<8x4xf32>
    %88 = tpu.matmul %86, %87, %cst_37 {dimension_numbers = #tpu.dot_dimension_numbers<[1], [1], [0], [0], [0, 0, 1, 0], [], []>} : vector<8x8xbf16>, vector<4x8xbf16>, vector<8x4xf32> -> vector<8x4xf32>
    %cst_38 = arith.constant dense<0xFF800000> : vector<8xf32>
    %89 = vector.multi_reduction <maximumf>, %88, %cst_38 [1] : vector<8x4xf32> to vector<8xf32>
    %90 = vector.shape_cast %89 : vector<8xf32> to vector<8x1xf32>
    %91 = vector.broadcast %90 : vector<8x1xf32> to vector<8x4xf32>
    %92 = arith.subf %88, %91 : vector<8x4xf32>
    %93 = math.exp %92 : vector<8x4xf32>
    %cst_39 = arith.constant dense<0.000000e+00> : vector<8xf32>
    %94 = vector.multi_reduction <add>, %93, %cst_39 [1] : vector<8x4xf32> to vector<8xf32>
    %95 = vector.shape_cast %94 : vector<8xf32> to vector<8x1xf32>
    %96 = tpu.reciprocal %95 {approx = true} : vector<8x1xf32> -> vector<8x1xf32>
    %97 = vector.broadcast %96 : vector<8x1xf32> to vector<8x4xf32>
    %98 = arith.mulf %93, %97 : vector<8x4xf32>
    %99 = arith.addf %98, %42 : vector<8x4xf32>
    %100 = arith.truncf %99 : vector<8x4xf32> to vector<8x4xbf16>
    %101 = vector.extract_strided_slice %16 {offsets = [0, 16], sizes = [4, 8], strides = [1, 1]} : vector<4x32xbf16> to vector<4x8xbf16>
    %cst_40 = arith.constant dense<0.000000e+00> : vector<8x8xf32>
    %102 = tpu.matmul %100, %101, %cst_40 {dimension_numbers = #tpu.dot_dimension_numbers<[1], [0], [0], [1], [0, 0, 1, 1], [], []>} : vector<8x4xbf16>, vector<4x8xbf16>, vector<8x8xf32> -> vector<8x8xf32>
    %103 = arith.truncf %102 : vector<8x8xf32> to vector<8x8xbf16>
    %c16 = arith.constant 16 : index
    %c0_41 = arith.constant 0 : index
    %104 = vector.load %arg8[%c16, %c0_41] : memref<32x32xbf16, #tpu.memory_space<vmem>>, vector<8x32xbf16>
    %cst_42 = arith.constant dense<0.000000e+00> : vector<8x32xf32>
    %105 = tpu.matmul %103, %104, %cst_42 {dimension_numbers = #tpu.dot_dimension_numbers<[1], [0], [0], [1], [0, 0, 1, 1], [], []>} : vector<8x8xbf16>, vector<8x32xbf16>, vector<8x32xf32> -> vector<8x32xf32>
    %106 = arith.addf %85, %105 : vector<8x32xf32>
    %107 = vector.extract_strided_slice %14 {offsets = [0, 24], sizes = [8, 8], strides = [1, 1]} : vector<8x32xbf16> to vector<8x8xbf16>
    %108 = vector.extract_strided_slice %15 {offsets = [0, 24], sizes = [4, 8], strides = [1, 1]} : vector<4x32xbf16> to vector<4x8xbf16>
    %cst_43 = arith.constant dense<0.000000e+00> : vector<8x4xf32>
    %109 = tpu.matmul %107, %108, %cst_43 {dimension_numbers = #tpu.dot_dimension_numbers<[1], [1], [0], [0], [0, 0, 1, 0], [], []>} : vector<8x8xbf16>, vector<4x8xbf16>, vector<8x4xf32> -> vector<8x4xf32>
    %cst_44 = arith.constant dense<0xFF800000> : vector<8xf32>
    %110 = vector.multi_reduction <maximumf>, %109, %cst_44 [1] : vector<8x4xf32> to vector<8xf32>
    %111 = vector.shape_cast %110 : vector<8xf32> to vector<8x1xf32>
    %112 = vector.broadcast %111 : vector<8x1xf32> to vector<8x4xf32>
    %113 = arith.subf %109, %112 : vector<8x4xf32>
    %114 = math.exp %113 : vector<8x4xf32>
    %cst_45 = arith.constant dense<0.000000e+00> : vector<8xf32>
    %115 = vector.multi_reduction <add>, %114, %cst_45 [1] : vector<8x4xf32> to vector<8xf32>
    %116 = vector.shape_cast %115 : vector<8xf32> to vector<8x1xf32>
    %117 = tpu.reciprocal %116 {approx = true} : vector<8x1xf32> -> vector<8x1xf32>
    %118 = vector.broadcast %117 : vector<8x1xf32> to vector<8x4xf32>
    %119 = arith.mulf %114, %118 : vector<8x4xf32>
    %120 = arith.addf %119, %42 : vector<8x4xf32>
    %121 = arith.truncf %120 : vector<8x4xf32> to vector<8x4xbf16>
    %122 = vector.extract_strided_slice %16 {offsets = [0, 24], sizes = [4, 8], strides = [1, 1]} : vector<4x32xbf16> to vector<4x8xbf16>
    %cst_46 = arith.constant dense<0.000000e+00> : vector<8x8xf32>
    %123 = tpu.matmul %121, %122, %cst_46 {dimension_numbers = #tpu.dot_dimension_numbers<[1], [0], [0], [1], [0, 0, 1, 1], [], []>} : vector<8x4xbf16>, vector<4x8xbf16>, vector<8x8xf32> -> vector<8x8xf32>
    %124 = arith.truncf %123 : vector<8x8xf32> to vector<8x8xbf16>
    %c24 = arith.constant 24 : index
    %c0_47 = arith.constant 0 : index
    %125 = vector.load %arg8[%c24, %c0_47] : memref<32x32xbf16, #tpu.memory_space<vmem>>, vector<8x32xbf16>
    %cst_48 = arith.constant dense<0.000000e+00> : vector<8x32xf32>
    %126 = tpu.matmul %124, %125, %cst_48 {dimension_numbers = #tpu.dot_dimension_numbers<[1], [0], [0], [1], [0, 0, 1, 1], [], []>} : vector<8x8xbf16>, vector<8x32xbf16>, vector<8x32xf32> -> vector<8x32xf32>
    %127 = arith.addf %106, %126 : vector<8x32xf32>
    %128 = arith.addf %127, %7 : vector<8x32xf32>
    %c0_49 = arith.constant 0 : index
    %c0_50 = arith.constant 0 : index
    %129 = vector.load %arg9[%c0_49, %c0_50] : memref<1x32xf32, #tpu.memory_space<vmem>>, vector<1x32xf32>
    %c0_51 = arith.constant 0 : index
    %c0_52 = arith.constant 0 : index
    %130 = vector.load %arg10[%c0_51, %c0_52] : memref<1x32xf32, #tpu.memory_space<vmem>>, vector<1x32xf32>
    %cst_53 = arith.constant dense<0.000000e+00> : vector<8xf32>
    %131 = vector.multi_reduction <add>, %128, %cst_53 [1] : vector<8x32xf32> to vector<8xf32>
    %132 = vector.shape_cast %131 : vector<8xf32> to vector<8x1xf32>
    %cst_54 = arith.constant 3.200000e+01 : f32
    %133 = vector.broadcast %cst_54 : f32 to vector<8x1xf32>
    %134 = arith.divf %132, %133 : vector<8x1xf32>
    %135 = vector.broadcast %134 : vector<8x1xf32> to vector<8x32xf32>
    %136 = arith.subf %128, %135 : vector<8x32xf32>
    %137 = arith.mulf %136, %136 : vector<8x32xf32>
    %cst_55 = arith.constant dense<0.000000e+00> : vector<8xf32>
    %138 = vector.multi_reduction <add>, %137, %cst_55 [1] : vector<8x32xf32> to vector<8xf32>
    %139 = vector.shape_cast %138 : vector<8xf32> to vector<8x1xf32>
    %cst_56 = arith.constant 3.200000e+01 : f32
    %140 = vector.broadcast %cst_56 : f32 to vector<8x1xf32>
    %141 = arith.divf %139, %140 : vector<8x1xf32>
    %142 = vector.broadcast %134 : vector<8x1xf32> to vector<8x32xf32>
    %143 = arith.subf %128, %142 : vector<8x32xf32>
    %cst_57 = arith.constant 9.99999974E-6 : f32
    %144 = vector.broadcast %cst_57 : f32 to vector<8x1xf32>
    %145 = arith.addf %141, %144 : vector<8x1xf32>
    %146 = math.rsqrt %145 : vector<8x1xf32>
    %147 = vector.broadcast %146 : vector<8x1xf32> to vector<8x32xf32>
    %148 = arith.mulf %143, %147 : vector<8x32xf32>
    %149 = vector.broadcast %129 : vector<1x32xf32> to vector<8x32xf32>
    %150 = arith.mulf %148, %149 : vector<8x32xf32>
    %151 = vector.broadcast %130 : vector<1x32xf32> to vector<8x32xf32>
    %152 = arith.addf %150, %151 : vector<8x32xf32>
    %153 = arith.truncf %152 : vector<8x32xf32> to vector<8x32xbf16>
    %c0_58 = arith.constant 0 : index
    %c0_59 = arith.constant 0 : index
    %154 = vector.load %arg11[%c0_58, %c0_59] : memref<32x64xbf16, #tpu.memory_space<vmem>>, vector<32x64xbf16>
    %cst_60 = arith.constant dense<0.000000e+00> : vector<8x64xf32>
    %155 = tpu.matmul %153, %154, %cst_60 {dimension_numbers = #tpu.dot_dimension_numbers<[1], [0], [0], [1], [0, 0, 1, 1], [], []>} : vector<8x32xbf16>, vector<32x64xbf16>, vector<8x64xf32> -> vector<8x64xf32>
    %cst_61 = arith.constant 0.000000e+00 : f32
    %156 = vector.broadcast %cst_61 : f32 to vector<8x64xf32>
    %157 = arith.maximumf %155, %156 : vector<8x64xf32>
    %158 = arith.truncf %157 : vector<8x64xf32> to vector<8x64xbf16>
    %c0_62 = arith.constant 0 : index
    %c0_63 = arith.constant 0 : index
    %159 = vector.load %arg12[%c0_62, %c0_63] : memref<64x32xbf16, #tpu.memory_space<vmem>>, vector<64x32xbf16>
    %cst_64 = arith.constant dense<0.000000e+00> : vector<8x32xf32>
    %160 = tpu.matmul %158, %159, %cst_64 {dimension_numbers = #tpu.dot_dimension_numbers<[1], [0], [0], [1], [0, 0, 1, 1], [], []>} : vector<8x64xbf16>, vector<64x32xbf16>, vector<8x32xf32> -> vector<8x32xf32>
    %161 = arith.addf %160, %152 : vector<8x32xf32>
    %c0_65 = arith.constant 0 : index
    %c0_66 = arith.constant 0 : index
    %162 = vector.load %arg13[%c0_65, %c0_66] : memref<1x32xf32, #tpu.memory_space<vmem>>, vector<1x32xf32>
    %c0_67 = arith.constant 0 : index
    %c0_68 = arith.constant 0 : index
    %163 = vector.load %arg14[%c0_67, %c0_68] : memref<1x32xf32, #tpu.memory_space<vmem>>, vector<1x32xf32>
    %cst_69 = arith.constant dense<0.000000e+00> : vector<8xf32>
    %164 = vector.multi_reduction <add>, %161, %cst_69 [1] : vector<8x32xf32> to vector<8xf32>
    %165 = vector.shape_cast %164 : vector<8xf32> to vector<8x1xf32>
    %cst_70 = arith.constant 3.200000e+01 : f32
    %166 = vector.broadcast %cst_70 : f32 to vector<8x1xf32>
    %167 = arith.divf %165, %166 : vector<8x1xf32>
    %168 = vector.broadcast %167 : vector<8x1xf32> to vector<8x32xf32>
    %169 = arith.subf %161, %168 : vector<8x32xf32>
    %170 = arith.mulf %169, %169 : vector<8x32xf32>
    %cst_71 = arith.constant dense<0.000000e+00> : vector<8xf32>
    %171 = vector.multi_reduction <add>, %170, %cst_71 [1] : vector<8x32xf32> to vector<8xf32>
    %172 = vector.shape_cast %171 : vector<8xf32> to vector<8x1xf32>
    %cst_72 = arith.constant 3.200000e+01 : f32
    %173 = vector.broadcast %cst_72 : f32 to vector<8x1xf32>
    %174 = arith.divf %172, %173 : vector<8x1xf32>
    %175 = vector.broadcast %167 : vector<8x1xf32> to vector<8x32xf32>
    %176 = arith.subf %161, %175 : vector<8x32xf32>
    %cst_73 = arith.constant 9.99999974E-6 : f32
    %177 = vector.broadcast %cst_73 : f32 to vector<8x1xf32>
    %178 = arith.addf %174, %177 : vector<8x1xf32>
    %179 = math.rsqrt %178 : vector<8x1xf32>
    %180 = vector.broadcast %179 : vector<8x1xf32> to vector<8x32xf32>
    %181 = arith.mulf %176, %180 : vector<8x32xf32>
    %182 = vector.broadcast %162 : vector<1x32xf32> to vector<8x32xf32>
    %183 = arith.mulf %181, %182 : vector<8x32xf32>
    %184 = vector.broadcast %163 : vector<1x32xf32> to vector<8x32xf32>
    %185 = arith.addf %183, %184 : vector<8x32xf32>
    %186 = vector.shape_cast %185 : vector<8x32xf32> to vector<1x8x32xf32>
    %c0_74 = arith.constant 0 : index
    %c0_75 = arith.constant 0 : index
    %c0_76 = arith.constant 0 : index
    %187 = vector.load %arg15[%c0_74, %c0_75, %c0_76] : memref<1x8x32xf32, #tpu.memory_space<vmem>>, vector<1x8x32xf32>
    tpu.vector_store %arg15[%c0_74, %c0_75, %c0_76], %186 {strides = array<i32>} : memref<1x8x32xf32, #tpu.memory_space<vmem>>, vector<1x8x32xf32>,
    return
  }
  func.func @transform_0(%arg0: i32) -> (i32, i32, i32) {
    %c0_i32 = arith.constant 0 : i32
    %c0_i32_0 = arith.constant 0 : i32
    %c0_i32_1 = arith.constant 0 : i32
    return %arg0, %c0_i32, %c0_i32_0 : i32, i32, i32
  }
  func.func @transform_1(%arg0: i32) -> (i32, i32, i32) {
    %c0_i32 = arith.constant 0 : i32
    %c0_i32_0 = arith.constant 0 : i32
    %c0_i32_1 = arith.constant 0 : i32
    return %arg0, %c0_i32, %c0_i32_0 : i32, i32, i32
  }
  func.func @transform_2(%arg0: i32) -> (i32, i32, i32) {
    %c0_i32 = arith.constant 0 : i32
    %c0_i32_0 = arith.constant 0 : i32
    %c0_i32_1 = arith.constant 0 : i32
    return %arg0, %c0_i32, %c0_i32_0 : i32, i32, i32
  }
  func.func @transform_3(%arg0: i32) -> (i32, i32, i32) {
    %c0_i32 = arith.constant 0 : i32
    %c0_i32_0 = arith.constant 0 : i32
    %c0_i32_1 = arith.constant 0 : i32
    %c0_i32_2 = arith.constant 0 : i32
    return %c0_i32, %c0_i32_0, %c0_i32_1 : i32, i32, i32
  }
  func.func @transform_4(%arg0: i32) -> (i32, i32) {
    %c0_i32 = arith.constant 0 : i32
    %c0_i32_0 = arith.constant 0 : i32
    %c0_i32_1 = arith.constant 0 : i32
    return %c0_i32, %c0_i32_0 : i32, i32
  }
  func.func @transform_5(%arg0: i32) -> (i32, i32) {
    %c0_i32 = arith.constant 0 : i32
    %c0_i32_0 = arith.constant 0 : i32
    %c0_i32_1 = arith.constant 0 : i32
    return %c0_i32, %c0_i32_0 : i32, i32
  }
  func.func @transform_6(%arg0: i32) -> (i32, i32) {
    %c0_i32 = arith.constant 0 : i32
    %c0_i32_0 = arith.constant 0 : i32
    %c0_i32_1 = arith.constant 0 : i32
    return %c0_i32, %c0_i32_0 : i32, i32
  }
  func.func @transform_7(%arg0: i32) -> (i32, i32) {
    %c0_i32 = arith.constant 0 : i32
    %c0_i32_0 = arith.constant 0 : i32
    %c0_i32_1 = arith.constant 0 : i32
    return %c0_i32, %c0_i32_0 : i32, i32
  }
  func.func @transform_8(%arg0: i32) -> (i32, i32) {
    %c0_i32 = arith.constant 0 : i32
    %c0_i32_0 = arith.constant 0 : i32
    %c0_i32_1 = arith.constant 0 : i32
    return %c0_i32, %c0_i32_0 : i32, i32
  }
  func.func @transform_9(%arg0: i32) -> (i32, i32) {
    %c0_i32 = arith.constant 0 : i32
    %c0_i32_0 = arith.constant 0 : i32
    %c0_i32_1 = arith.constant 0 : i32
    return %c0_i32, %c0_i32_0 : i32, i32
  }
  func.func @transform_10(%arg0: i32) -> (i32, i32) {
    %c0_i32 = arith.constant 0 : i32
    %c0_i32_0 = arith.constant 0 : i32
    %c0_i32_1 = arith.constant 0 : i32
    return %c0_i32, %c0_i32_0 : i32, i32
  }
  func.func @transform_11(%arg0: i32) -> (i32, i32) {
    %c0_i32 = arith.constant 0 : i32
    %c0_i32_0 = arith.constant 0 : i32
    %c0_i32_1 = arith.constant 0 : i32
    return %c0_i32, %c0_i32_0 : i32, i32
  }
  func.func @transform_12(%arg0: i32) -> (i32, i32) {
    %c0_i32 = arith.constant 0 : i32
    %c0_i32_0 = arith.constant 0 : i32
    %c0_i32_1 = arith.constant 0 : i32
    return %c0_i32, %c0_i32_0 : i32, i32
  }
  func.func @transform_13(%arg0: i32) -> (i32, i32) {
    %c0_i32 = arith.constant 0 : i32
    %c0_i32_0 = arith.constant 0 : i32
    %c0_i32_1 = arith.constant 0 : i32
    return %c0_i32, %c0_i32_0 : i32, i32
  }
  func.func @transform_14(%arg0: i32) -> (i32, i32, i32) {
    %c0_i32 = arith.constant 0 : i32
    %c0_i32_0 = arith.constant 0 : i32
    %c0_i32_1 = arith.constant 0 : i32
    return %arg0, %c0_i32, %c0_i32_0 : i32, i32, i32
  }
}

</mosaic_0001>

<bundles_post_ra>
// kernel: mul.5
= control target key start
LH: loop header
LB: loop body
LE: loop exit
PB: predicated region body
PF: predicated region fallthrough
CT: control target
= control target key end

     0   :  { %s20_s0 = inlined_call_operand.<no memory space> [shape: f32[], index: 0, kind: input, shape index: {}]   ;;  %s21_s1 = inlined_call_operand.vmem [shape: f32[1,1,4], index: 1, kind: output, shape index: {}]  }
   0x1   :  { %v2_v0 = vstv %s20_s0 }
   0x2   :  { %3 = vst [vmem:[%s21_s1] sm:$0x1] %v2_v0 }

// kernel: isab_forward.2
= control target key start
LH: loop header
LB: loop body
LE: loop exit
PB: predicated region body
PF: predicated region fallthrough
CT: control target
= control target key end

     0   :  { %s1956_s29 = smov 0   ;;  %s2194_s0 = inlined_call_operand.vmem [shape: f32[1,4,32], index: 0, kind: input, shape index: {}]   ;;  %s2195_s1 = inlined_call_operand.vmem [shape: f32[2,8,32], index: 1, kind: input, shape index: {}]   ;;  %s2196_s2 = inlined_call_operand.vmem [shape: f32[1,4,1], index: 2, kind: input, shape index: {}]   ;;  %s2197_s3 = inlined_call_operand.vmem [shape: f32[2,1,8], index: 3, kind: input, shape index: {}]   ;;  %s2198_s4 = inlined_call_operand.vmem [shape: bf16[32,32], index: 4, kind: input, shape index: {}]   ;;  %s2199_s5 = inlined_call_operand.vmem [shape: bf16[32,32], index: 5, kind: input, shape index: {}]   ;;  %s2200_s6 = inlined_call_operand.vmem [shape: bf16[32,32], index: 6, kind: input, shape index: {}]   ;;  %s2201_s7 = inlined_call_operand.vmem [shape: bf16[32,32], index: 7, kind: input, shape index: {}]   ;;  %s2202_s8 = inlined_call_operand.vmem [shape: f32[1,32], index: 8, kind: input, shape index: {}]   ;;  %s2203_s9 = inlined_call_operand.vmem [shape: f32[1,32], index: 9, kind: input, shape index: {}]   ;;  %s2204_s10 = inlined_call_operand.vmem [shape: bf16[32,64], index: 10, kind: input, shape index: {}]   ;;  %s2205_s11 = inlined_call_operand.vmem [shape: bf16[64,32], index: 11, kind: input, shape index: {}]   ;;  %s2206_s12 = inlined_call_operand.vmem [shape: f32[1,32], index: 12, kind: input, shape index: {}]   ;;  %s2207_s13 = inlined_call_operand.vmem [shape: f32[1,32], index: 13, kind: input, shape index: {}]   ;;  %s2208_s14 = inlined_call_operand.vmem [shape: f32[2,4,32], index: 14, kind: output, shape index: {}]  }
   0x1 LB: > { %s1612_s30 = sadd.s32 4294967295, %s1873_s29   ;;  %p1616_p0 = scmp.ge.s32.totalorder %s1873_s29, 1  ;;  %s1873_s29 = sphi %s1956_s29, %s24_s29  }
   0x2   : > { %p419_p1 = scmp.lt.s32.totalorder %s1873_s29, 3 }
   0x4   : > { %p420_p2 = pnand %p1616_p0, %p419_p1 }
   0x5   : > { %p466_p3 = scmp.lt.s32.totalorder (!%p420_p2), %s1612_s30, 1  ;;  %s1877_s15 = smov (!%p420_p2), 120  }
   0x6   : > { %423 = sbr.rel (%p420_p2) target bundleno = 3487 (0xd9f), region = 76  ;;  %s1878_s19 = smov (!%p420_p2), 112  }
   0xb   : > { %v1831_v0 = vld [vmem:[%s2198_s4 + $0x8] sm:$0xff]   ;;  %v1875_v1 = vmov 0.0   ;;  %v1832_v2 = vld [vmem:[%s2198_s4] sm:$0xff]   ;;  %vm1876_vm0 = vmmov 0   ;;  %vm498_vm1 = vcmask 261120   ;;  %s2210_s30 = smov (!%p466_p3, %s1612_s30), 1 }
   0xc   : > { %1695 = vmatprep.subr.bf16.mxu1 %v1875_v1  ;;  %1711 = vmatprep.subr.bf16.mxu0 %v1875_v1  ;;  %v478_v3 = vld [vmem:[%s2194_s0] sm:$0xf]  ;;  %v1833_v5 = vld [vmem:[%s2199_s5 + $0x8] sm:$0xff]   ;;  %s1617_s23 = sshll.u32 %s2210_s30, 3  ;;  %vm712_vm2 = vcmask 64512   ;;  %s472_s18 = scalar_lea.vmem %s2197_s3, %s2210_s30  ;;  %vm677_vm3 = vcmask 57344  }
   0xd   : > { %1696 = vmatpush3.bf16.msra.mxu1 %v1831_v0  ;;  %1699 = vmatprep.mubr.msk.bf16.mxu1 %vm1876_vm0, %v1875_v1  ;;  %v479_v4 = vpack.c.bf16 %v478_v3, %v478_v3  ;;  %s469_s26 = scalar_lea.vmem %s2195_s1, %s1617_s23  ;;  %v1834_v6 = vld [vmem:[%s2199_s5] sm:$0xff]   ;;  %v1835_v24 = vld [vmem:[%s2200_s6 + $0x8] sm:$0xff]   ;;  %v1879_v29 = vmov 0   ;;  %vm759_vm4 = vcmask 60416   ;;  %vm664_vm5 = vcmask 3072  }
   0xe   : > { %1697 = vmatprep.subr.bf16.mxu1 %v1875_v1  ;;  %1715 = vmatprep.mubr.msk.bf16.mxu0 %vm1876_vm0, %v1875_v1  ;;  %v480_v7 = vld [vmem:[%s469_s26] sm:$0xff]  ;;  %vm776_vm6 = vcmask 1043456   ;;  %vm1353_vm9 = vcmask 257024   ;;  %vm1476_vm10 = vcmask 523264  }
   0xf   : > { %v481_v8 = vpack.c.bf16 %v480_v7, %v480_v7  ;;  %v2023_v21 = vld [vmem:[%s472_s18] sm:$0x1]  ;;  %1712 = vmatpush3.bf16.msra.mxu0 %v1835_v24  ;;  %1829 = vset.pattern.permute.xlu1 %v1879_v29  ;;  %s1880_s18 = smov 104  }
  0x10   : > { %v676_v22 = vmul.f32 %v2023_v21, %v2023_v21  ;;  %v1836_v25 = vld [vmem:[%s2200_s6] sm:$0xff]   ;;  %1713 = vmatprep.subr.bf16.mxu0 %v1875_v1  ;;  %1830 = vset.pattern.permute.xlu0 %v1879_v29 }
  0x11   : > { %1698 = vmatpush3.bf16.msra.mxu1 %v1832_v2  ;;  %v661_v30 = vld [vmem:[%s2196_s2] sm:$0xf] }
  0x12   : > { %1703 = vmatprep.subr.bf16.mxu1 %v1875_v1  ;;  %v678_v23 = vsel %vm677_vm3, %v676_v22, 0.0  ;;  %v663_v31 = vmul.f32 %v661_v30, %v661_v30 }
  0x13   : > { %1714 = vmatpush3.bf16.msra.mxu0 %v1836_v25 }
  0x14   : > { %1700 = vmatmul.mubr.msk.bf16.vlgmr.msra.gmra.mxu1 %vm498_vm1, %v479_v4  ;;  %1725 = vmatprep.subr.bf16.mxu0 %v1875_v1  ;;  %v665_v35 = vsel %vm664_vm5, %v663_v31, 0.0 }
  0x15   : > { %1704 = vmatpush3.bf16.msra.mxu1 %v1833_v5  ;;  %1707 = vmatprep.mubr.msk.bf16.mxu1 %vm1876_vm0, %v1875_v1 }
  0x16   : > { %1705 = vmatprep.subr.bf16.mxu1 %v1875_v1  ;;  %1716 = vmatmul.mubr.msk.bf16.vlgmr.msra.gmra.mxu0 %vm498_vm1, %v481_v8 }
  0x17   : > { %1727 = vmatprep.mubr.msk.bf16.mxu0 %vm1876_vm0, %v1875_v1 }
  0x19   : > { %1706 = vmatpush3.bf16.msra.mxu1 %v1834_v6 }
  0x1a   : > { %1719 = vmatprep.subr.bf16.mxu1 %v1875_v1 }
  0x1c   : > { %1708 = vmatmul.mubr.msk.bf16.vlgmr.msra.gmra.mxu1 %vm498_vm1, %v481_v8 }
  0x1d   : > { %1721 = vmatprep.mubr.msk.bf16.mxu1 %vm1876_vm0, %v1875_v1 }
  0xd4   : > { %v2001_v9 = vpop.f32.mrf.mxu1 }
  0xd5   : > { %v657_v14 = vmul.f32 0.35355338, %v2001_v9 }
  0xd6   : > { %v1701_v10 = vpop.f32.mrf.mxu1  ;;  %v651_v53 = vpop.f32.mrf.mxu0 }
  0xd7   : > { %v2010_v19 = vpack.c.bf16 %v657_v14, %v657_v14  ;;  %v2051_v3 = vpack.c.bf16 %v651_v53, %v651_v53 }
  0xd8   : > { %v539_v11 = vpop.f32.mrf.mxu1  ;;  %v1717_v55 = vpop.f32.mrf.mxu0 }
  0xd9   : > { %v778_v4 = vsel %vm776_vm6, %v2051_v3, 0 }
  0xda   : > { %v1702_v12 = vpop.f32.mrf.mxu1  ;;  %v654_v59 = vpop.f32.mrf.mxu0  ;;  %1726 = vmatpush3.bf16.msra.mxu0 %v778_v4 }
  0xdb   : > { %1737 = vmatprep.subr.bf16.mxu0 %v1875_v1 }
  0xdc   : > { %v595_v13 = vpop.f32.mrf.mxu1  ;;  %v1718_v61 = vpop.f32.mrf.mxu0 }
  0xdd   : > { %v2004_v15 = vpack.c.bf16 %v595_v13, %v595_v13 }
  0xde   : > { %v1709_v16 = vpop.f32.mrf.mxu1 }
  0xdf   : > { %826 = vrot.lane.b32.xlu0 %v2004_v15, %s1877_s15  ;;  %v717_v17 = vsel %vm712_vm2, %v2004_v15, 0 }
  0xe0   : > { %v598_v18 = vpop.f32.mrf.mxu1  ;;  %1720 = vmatpush3.bf16.xpose.msra.mxu1 %v717_v17 }
  0xe1   : > { %1731 = vmatprep.subr.bf16.mxu1 %v1875_v1 }
  0xe2   : > { %v1710_v20 = vpop.f32.mrf.mxu1 }
  0xe3   : > { %823 = vrot.lane.b32.xlu0 %v2010_v19, %s1877_s15 }
  0xe7   : > { %1722 = vmatmul.mubr.msk.bf16.vlgmr.msra.gmra.mxu1 %vm712_vm2, %v2010_v19 }
  0xe8   : > { %1733 = vmatprep.mubr.msk.bf16.mxu1 %vm1876_vm0, %v1875_v1 }
 0x102   : > { %679 = vadd.xlane.f32.xlu0 %v678_v23  ;;  %v705_v23 = vlaneseq }
 0x104   : > { %v706_v25 = vshrl.u32 %v705_v23, 7 }
 0x118   : > { %1032 = vrot.lane.b32.xlu0 %v2004_v15, %s1878_s19 }
 0x151   : > { %v827_v26 = vpop.permute.xlu0 %826 }
 0x152   : > { %v832_v27 = vsel %vm712_vm2, %v827_v26, 0 }
 0x153   : > { %1732 = vmatpush3.bf16.xpose.msra.mxu1 %v832_v27  ;;  %v707_v27 = vsub.s32 0, %v706_v25 }
 0x154   : > { %1743 = vmatprep.subr.bf16.mxu1 %v1875_v1 }
 0x155   : > { %v824_v28 = vpop.permute.xlu0 %823 }
 0x15a   : > { %1734 = vmatmul.mubr.msk.bf16.vlgmr.msra.gmra.mxu1 %vm712_vm2, %v824_v28  ;;  %v708_v28 = vrot.slane %v2023_v21, %v707_v27 }
 0x15b   : > { %1745 = vmatprep.mubr.msk.bf16.mxu1 %vm1876_vm0, %v1875_v1 }
 0x18b   : > { %v680_v43 = vpop.xlane.xlu0 %679 }
 0x18c   : > { %v681_v44 = vrot.slane %v680_v43, 4 }
 0x18e   : > { %v682_v45 = vadd.f32 %v681_v44, %v680_v43 }
 0x190   : > { %v683_v47 = vrot.slane %v682_v45, 2 }
 0x192   : > { %v684_v51 = vadd.f32 %v683_v47, %v682_v45 }
 0x194   : > { %v685_v57 = vrot.slane %v684_v51, 1 }
 0x196   : > { %v686_v62 = vadd.f32 %v685_v57, %v684_v51  ;;  %v1033_v51 = vpop.permute.xlu0 %1032 }
 0x197   : > { %v1038_v55 = vsel %vm712_vm2, %v1033_v51, 0 }
 0x1a7   : > { %v753_v32 = vpop.f32.mrf.mxu1 }
 0x1a8   : > { %v760_v33 = vsel %vm759_vm4, %v753_v32, -inf }
 0x1a9   : > { %761 = vmax.xlane.f32.xlu1 %v760_v33  ;;  %v1723_v34 = vpop.f32.mrf.mxu1 }
 0x1ab   : > { %v756_v36 = vpop.f32.mrf.mxu1 }
 0x1ac   : > { %v937_v36 = vld [vmem:[%s2201_s7 + $0x4] sm:$0xf] }
 0x1ad   : > { %v1724_v37 = vpop.f32.mrf.mxu1  ;;  %666 = vadd.xlane.f32.xlu1 %v665_v35  ;;  %v942_v21 = vsel %vm776_vm6, %v937_v36, 0 }
 0x1ae   : > { %1744 = vmatpush3.bf16.msra.mxu1 %v942_v21 }
 0x1af   : > { %1755 = vmatprep.subr.bf16.mxu1 %v1875_v1 }
 0x21a   : > { %v868_v38 = vpop.f32.mrf.mxu1 }
 0x21b   : > { %v874_v39 = vsel %vm759_vm4, %v868_v38, -inf }
 0x21c   : > { %875 = vmax.xlane.f32.xlu1 %v874_v39  ;;  %v1735_v40 = vpop.f32.mrf.mxu1 }
 0x21e   : > { %v871_v41 = vpop.f32.mrf.mxu1 }
 0x220   : > { %v1736_v42 = vpop.f32.mrf.mxu1 }
 0x221   : > { %v821_v42 = vld [vmem:[%s2201_s7] sm:$0xf] }
 0x222   : > { %v988_v45 = vsel %vm776_vm6, %v821_v42, 0 }
 0x22d   : > { %701 = vperm.xlu1 %1829, %v661_v30  }
 0x232   : > { %v762_v46 = vpop.xlane.xlu1 %761 }
 0x233   : > { %v763_v50 = vsub.f32 %v753_v32, %v762_v46 }
 0x235   : > { %v764_v56 = vmul.f32 1.442695, %v763_v50 }
 0x236   : > { %v667_v48 = vpop.xlane.xlu1 %666 }
 0x237   : > { %v668_v49 = vrot.slane %v667_v48, 4  ;;  %1843 = vpow2.f32 %v764_v56 }
 0x239   : > { %v669_v52 = vadd.f32 %v668_v49, %v667_v48 }
 0x23b   : > { %v670_v54 = vrot.slane %v669_v52, 2 }
 0x23d   : > { %v671_v58 = vadd.f32 %v670_v54, %v669_v52 }
 0x23f   : > { %v672_v60 = vrot.slane %v671_v58, 1 }
 0x241   : > { %v673_v63 = vadd.f32 %v672_v60, %v671_v58 }
 0x243   : > { %1811 = vpush %v673_v63 }
 0x244   : > { %1813 = vpush %v686_v62  ;;  %v1844_v0 = vpop.eup %1843 }
 0x245   : > { %v766_v2 = vsel %vm759_vm4, %v1844_v0, 0.0 }
 0x251   : > { %767 = vadd.xlane.f32.xlu1 %v766_v2 }
 0x274   : > { %s1812_s26 = spop %1811 }
 0x275   : > { %s1814_s27 = spop %1813  ;;  %v675_v8 = vstv %s1812_s26 }
 0x276   : > { %v688_v10 = vstv %s1814_s27  ;;  %s1618_s27 = sshll.u32 %s2210_s30, 2 }
 0x277   : > { %v689_v11 = vmul.f32 %v688_v10, %v675_v8 }
 0x279   : > { %vm692_vm7 = vcmp.eq.f32.partialorder %v689_v11, inf  ;;  %v695_v17 = vand.u32 2147483648, %v689_v11  ;;  %vm694_vm8 = vcmp.eq.f32.partialorder %v689_v11, 0.0 }
 0x2a5   : > { %v876_v5 = vpop.xlane.xlu1 %875 }
 0x2a6   : > { %v877_v6 = vsub.f32 %v868_v38, %v876_v5 }
 0x2a8   : > { %v878_v7 = vmul.f32 1.442695, %v877_v6 }
 0x2a9   : > { %v702_v24 = vpop.permute.xlu1 %701 }
 0x2aa   : > { %1845 = vpow2.f32 %v878_v7  ;;  %v710_v29 = vmul.f32 %v708_v28, %v702_v24 }
 0x2ab   : > { %1847 = vrsqrt.f32 %v689_v11 }
 0x2b7   : > { %v1846_v12 = vpop.eup %1845 }
 0x2b8   : > { %v880_v13 = vsel %vm759_vm4, %v1846_v12, 0.0  ;;  %v1848_v14 = vpop.eup %1847 }
 0x2b9   : > { %881 = vadd.xlane.f32.xlu1 %v880_v13  ;;  %v691_v16 = vmul.f32 %v1848_v14, %v689_v11 }
 0x2bb   : > { %v693_v18 = vsel %vm692_vm7, %v689_v11, %v691_v16 }
 0x2bc   : > { %v696_v20 = vsel %vm694_vm8, %v695_v17, %v693_v18 }
 0x2bd   : > { %v697_v22 = vadd.f32 1e-05, %v696_v20 }
 0x2bf   : > { %1849 = vrcp.f32 %v697_v22 }
 0x2ca   : > { %888 = vrot.lane.b32.xlu1 %v2051_v3, %s1877_s15 }
 0x2cc   : > { %v1850_v30 = vpop.eup %1849 }
 0x2cd   : > { %v2062_v31 = vmul.f32 %v1850_v30, %v710_v29 }
 0x2ce   : > { %1030 = vrot.lane.b32.xlu1 %v2010_v19, %s1878_s19 }
 0x2da   : > { %v768_v26 = vpop.xlane.xlu1 %767 }
 0x2db   : > { %1851 = vrcp.f32 %v768_v26 }
 0x2e8   : > { %v1852_v32 = vpop.eup %1851 }
 0x2e9   : > { %v770_v33 = vmul.f32 %v1852_v32, %v1844_v0 }
 0x2eb   : > { %v771_v34 = vadd.f32 %v770_v33, %v2062_v31 }
 0x2ed   : > { %v772_v35 = vpack.c.bf16 %v771_v34, %v771_v34 }
 0x2ef   : > { %1728 = vmatmul.mubr.msk.bf16.vlgmr.msra.gmra.mxu0 %vm712_vm2, %v772_v35 }
 0x2f0   : > { %1739 = vmatprep.mubr.msk.bf16.mxu0 %vm1876_vm0, %v1875_v1 }
 0x342   : > { %v882_v37 = vpop.xlane.xlu1 %881 }
 0x343   : > { %1853 = vrcp.f32 %v882_v37 }
 0x346   : > { %v889_v38 = vpop.permute.xlu1 %888 }
 0x347   : > { %v894_v39 = vsel %vm776_vm6, %v889_v38, 0 }
 0x348   : > { %1738 = vmatpush3.bf16.msra.mxu0 %v894_v39 }
 0x349   : > { %1749 = vmatprep.subr.bf16.mxu0 %v1875_v1 }
 0x34a   : > { %v1031_v58 = vpop.permute.xlu1 %1030 }
 0x350   : > { %v1854_v40 = vpop.eup %1853 }
 0x351   : > { %v884_v41 = vmul.f32 %v1854_v40, %v1846_v12 }
 0x353   : > { %v885_v43 = vadd.f32 %v884_v41, %v2062_v31 }
 0x355   : > { %v886_v44 = vpack.c.bf16 %v885_v43, %v885_v43 }
 0x357   : > { %1740 = vmatmul.mubr.msk.bf16.vlgmr.msra.gmra.mxu0 %vm712_vm2, %v886_v44 }
 0x358   : > { %1750 = vmatpush3.bf16.msra.mxu0 %v988_v45  ;;  %1751 = vmatprep.mubr.msk.bf16.mxu0 %vm1876_vm0, %v1875_v1 }
 0x359   : > { %1761 = vmatprep.subr.bf16.mxu0 %v1875_v1 }
 0x3af   : > { %v814_v46 = vpop.f32.mrf.mxu0 }
 0x3b0   : > { %v820_v47 = vpack.c.bf16 %v814_v46, %v814_v46 }
 0x3b1   : > { %v1729_v48 = vpop.f32.mrf.mxu0 }
 0x3b2   : > { %1752 = vmatmul.mubr.msk.bf16.vlgmr.msra.gmra.mxu0 %vm712_vm2, %v820_v47 }
 0x3b3   : > { %v817_v49 = vpop.f32.mrf.mxu0  ;;  %1763 = vmatprep.mubr.msk.bf16.mxu0 %vm1876_vm0, %v1875_v1 }
 0x3b4   : > { %v1302_v49 = vld [vmem:[%s2201_s7 + $0xc] sm:$0xf] }
 0x3b5   : > { %v1730_v50 = vpop.f32.mrf.mxu0 }
 0x3b6   : > { %v1307_v50 = vsel %vm776_vm6, %v1302_v49, 0 }
 0x417   : > { %v930_v52 = vpop.f32.mrf.mxu0 }
 0x418   : > { %v936_v53 = vpack.c.bf16 %v930_v52, %v930_v52 }
 0x419   : > { %v1741_v54 = vpop.f32.mrf.mxu0 }
 0x41a   : > { %1746 = vmatmul.mubr.msk.bf16.vlgmr.msra.gmra.mxu1 %vm712_vm2, %v936_v53 }
 0x41b   : > { %1756 = vmatpush3.bf16.xpose.msra.mxu1 %v1038_v55  ;;  %v933_v56 = vpop.f32.mrf.mxu0  ;;  %1757 = vmatprep.mubr.msk.bf16.mxu1 %vm1876_vm0, %v1875_v1 }
 0x41c   : > { %1767 = vmatprep.subr.bf16.mxu1 %v1875_v1 }
 0x41d   : > { %v1742_v57 = vpop.f32.mrf.mxu0 }
 0x422   : > { %1758 = vmatmul.mubr.msk.bf16.vlgmr.msra.gmra.mxu1 %vm712_vm2, %v1031_v58 }
 0x423   : > { %1769 = vmatprep.mubr.msk.bf16.mxu1 %vm1876_vm0, %v1875_v1 }
 0x472   : > { %v2095_v59 = vpop.f32.mrf.mxu0 }
 0x474   : > { %v1753_v60 = vpop.f32.mrf.mxu0 }
 0x476   : > { %v1027_v61 = vpop.f32.mrf.mxu0 }
 0x478   : > { %v1754_v62 = vpop.f32.mrf.mxu0 }
 0x4da   : > { %v2097_v63 = vpop.f32.mrf.mxu1 }
 0x4db   : > { %v1025_v46 = vadd.f32 %v2095_v59, %v2097_v63 }
 0x4dc   : > { %v1747_v0 = vpop.f32.mrf.mxu1 }
 0x4de   : > { %v981_v2 = vpop.f32.mrf.mxu1 }
 0x4e0   : > { %v1748_v4 = vpop.f32.mrf.mxu1 }
 0x4e2   : > { %v1074_v5 = vpop.f32.mrf.mxu1 }
 0x4e3   : > { %v1080_v6 = vsel %vm759_vm4, %v1074_v5, -inf }
 0x4e4   : > { %1081 = vmax.xlane.f32.xlu1 %v1080_v6  ;;  %v1759_v7 = vpop.f32.mrf.mxu1 }
 0x4e6   : > { %v1077_v8 = vpop.f32.mrf.mxu1 }
 0x4e8   : > { %v1760_v10 = vpop.f32.mrf.mxu1 }
 0x4f5   : > { %1093 = vrot.lane.b32.xlu1 %v2051_v3, %s1878_s19 }
 0x4f9   : > { %1190 = vrot.lane.b32.xlu1 %v2010_v19, %s1880_s18 }
 0x56d   : > { %v1082_v11 = vpop.xlane.xlu1 %1081 }
 0x56e   : > { %v1083_v12 = vsub.f32 %v1074_v5, %v1082_v11 }
 0x570   : > { %v1084_v13 = vmul.f32 1.442695, %v1083_v12 }
 0x571   : > { %v1094_v14 = vpop.permute.xlu1 %1093 }
 0x572   : > { %1855 = vpow2.f32 %v1084_v13  ;;  %v1099_v16 = vsel %vm776_vm6, %v1094_v14, 0  ;;  %v1837_v13 = vld [vmem:[%s2204_s10 + $0x8] sm:$0xff]   ;;  %v1839_v14 = vld [vmem:[%s2205_s11 + $0x18] sm:$0xff]  }
 0x573   : > { %1762 = vmatpush3.bf16.msra.mxu0 %v1099_v16  ;;  %v1840_v16 = vld [vmem:[%s2205_s11 + $0x10] sm:$0xff]  }
 0x574   : > { %1773 = vmatprep.subr.bf16.mxu0 %v1875_v1 }
 0x575   : > { %v1191_v27 = vpop.permute.xlu1 %1190 }
 0x57f   : > { %v1856_v17 = vpop.eup %1855 }
 0x580   : > { %v1086_v18 = vsel %vm759_vm4, %v1856_v17, 0.0 }
 0x581   : > { %1087 = vadd.xlane.f32.xlu0 %v1086_v18 }
 0x597   : > { %1192 = vrot.lane.b32.xlu0 %v2004_v15, %s1880_s18  ;;  %v1142_v15 = vld [vmem:[%s2201_s7 + $0x8] sm:$0xf] }
 0x598   : > { %v1147_v28 = vsel %vm776_vm6, %v1142_v15, 0 }
 0x599   : > { %1768 = vmatpush3.bf16.msra.mxu1 %v1147_v28 }
 0x59a   : > { %1779 = vmatprep.subr.bf16.mxu1 %v1875_v1 }
 0x60a   : > { %v1088_v20 = vpop.xlane.xlu0 %1087 }
 0x60b   : > { %1857 = vrcp.f32 %v1088_v20 }
 0x60e   : > { %v1193_v24 = vpop.permute.xlu0 %1192 }
 0x60f   : > { %v1198_v26 = vsel %vm712_vm2, %v1193_v24, 0 }
 0x618   : > { %v1858_v19 = vpop.eup %1857 }
 0x619   : > { %v1090_v22 = vmul.f32 %v1858_v19, %v1856_v17  ;;  %v1841_v17 = vld [vmem:[%s2205_s11 + $0x8] sm:$0xff]  }
 0x61b   : > { %v1091_v23 = vadd.f32 %v1090_v22, %v2062_v31 }
 0x61d   : > { %v1092_v25 = vpack.c.bf16 %v1091_v23, %v1091_v23  ;;  %v1640_v23 = vld [vmem:[%s2202_s8] ss:$0 sm:$0xff] }
 0x61f   : > { %1764 = vmatmul.mubr.msk.bf16.vlgmr.msra.gmra.mxu0 %vm712_vm2, %v1092_v25  ;;  %v1641_v25 = vld [vmem:[%s2203_s9] ss:$0 sm:$0xff] }
 0x620   : > { %1774 = vmatpush3.bf16.xpose.msra.mxu0 %v1198_v26  ;;  %1775 = vmatprep.mubr.msk.bf16.mxu0 %vm1876_vm0, %v1875_v1 }
 0x621   : > { %1785 = vmatprep.subr.bf16.mxu0 %v1875_v1 }
 0x627   : > { %1776 = vmatmul.mubr.msk.bf16.vlgmr.msra.gmra.mxu0 %vm712_vm2, %v1191_v27 }
 0x628   : > { %1787 = vmatprep.mubr.msk.bf16.mxu0 %vm1876_vm0, %v1875_v1  ;;  %1786 = vmatpush3.bf16.msra.mxu0 %v1307_v50  ;;  %v1651_v50 = vld [vmem:[%s2207_s13] ss:$0 sm:$0xff] }
 0x629   : > { %1799 = vmatprep.subr.bf16.mxu0 %v1875_v1 }
 0x6df   : > { %v1135_v29 = vpop.f32.mrf.mxu0 }
 0x6e0   : > { %v1141_v30 = vpack.c.bf16 %v1135_v29, %v1135_v29 }
 0x6e1   : > { %v1765_v32 = vpop.f32.mrf.mxu0 }
 0x6e2   : > { %1770 = vmatmul.mubr.msk.bf16.vlgmr.msra.gmra.mxu1 %vm712_vm2, %v1141_v30 }
 0x6e3   : > { %v1138_v33 = vpop.f32.mrf.mxu0  ;;  %1781 = vmatprep.mubr.msk.bf16.mxu1 %vm1876_vm0, %v1875_v1 }
 0x6e5   : > { %v1766_v34 = vpop.f32.mrf.mxu0 }
 0x6e7   : > { %v1234_v35 = vpop.f32.mrf.mxu0 }
 0x6e8   : > { %v1240_v36 = vsel %vm759_vm4, %v1234_v35, -inf }
 0x6e9   : > { %1241 = vmax.xlane.f32.xlu1 %v1240_v36  ;;  %v1777_v21 = vpop.f32.mrf.mxu0 }
 0x6eb   : > { %v1237_v37 = vpop.f32.mrf.mxu0 }
 0x6ed   : > { %v1778_v38 = vpop.f32.mrf.mxu0 }
 0x6fa   : > { %1253 = vrot.lane.b32.xlu1 %v2051_v3, %s1880_s18  ;;  %s476_s18 = scalar_lea.vmem %s2208_s14, %s1618_s27 }
 0x772   : > { %v1242_v39 = vpop.xlane.xlu1 %1241 }
 0x773   : > { %v1243_v40 = vsub.f32 %v1234_v35, %v1242_v39 }
 0x775   : > { %v1244_v41 = vmul.f32 1.442695, %v1243_v40 }
 0x776   : > { %v1254_v42 = vpop.permute.xlu1 %1253 }
 0x777   : > { %1859 = vpow2.f32 %v1244_v41  ;;  %v1259_v43 = vsel %vm776_vm6, %v1254_v42, 0 }
 0x778   : > { %1780 = vmatpush3.bf16.msra.mxu1 %v1259_v43 }
 0x779   : > { %1791 = vmatprep.subr.bf16.mxu1 %v1875_v1 }
 0x784   : > { %v1860_v44 = vpop.eup %1859 }
 0x785   : > { %v1246_v45 = vsel %vm759_vm4, %v1860_v44, 0.0 }
 0x786   : > { %1247 = vadd.xlane.f32.xlu0 %v1246_v45 }
 0x7a2   : > { %v1183_v47 = vpop.f32.mrf.mxu1 }
 0x7a3   : > { %v1189_v48 = vadd.f32 %v1183_v47, %v1025_v46 }
 0x7a4   : > { %v1771_v3 = vpop.f32.mrf.mxu1 }
 0x7a5   : > { %v1650_v3 = vld [vmem:[%s2206_s12] ss:$0 sm:$0xff] }
 0x7a6   : > { %v1186_v51 = vpop.f32.mrf.mxu1 }
 0x7a8   : > { %v1772_v52 = vpop.f32.mrf.mxu1 }
 0x80f   : > { %v1248_v53 = vpop.xlane.xlu0 %1247 }
 0x810   : > { %1861 = vrcp.f32 %v1248_v53 }
 0x81d   : > { %v1862_v54 = vpop.eup %1861 }
 0x81e   : > { %v1250_v55 = vmul.f32 %v1862_v54, %v1860_v44 }
 0x820   : > { %v1251_v56 = vadd.f32 %v1250_v55, %v2062_v31 }
 0x822   : > { %v1252_v57 = vpack.c.bf16 %v1251_v56, %v1251_v56 }
 0x824   : > { %1782 = vmatmul.mubr.msk.bf16.vlgmr.msra.gmra.mxu1 %vm712_vm2, %v1252_v57 }
 0x825   : > { %1795 = vmatprep.mubr.msk.bf16.mxu1 %vm1876_vm0, %v1875_v1  ;;  %1792 = vmatpush3.bf16.msra.mxu1 %v1837_v13 }
 0x826   : > { %1793 = vmatprep.subr.bf16.mxu1 %v1875_v1 }
 0x8e4   : > { %v1295_v58 = vpop.f32.mrf.mxu1 }
 0x8e5   : > { %v1301_v59 = vpack.c.bf16 %v1295_v58, %v1295_v58 }
 0x8e6   : > { %v1783_v60 = vpop.f32.mrf.mxu1 }
 0x8e7   : > { %1788 = vmatmul.mubr.msk.bf16.vlgmr.msra.gmra.mxu0 %vm712_vm2, %v1301_v59 }
 0x8e8   : > { %v1298_v61 = vpop.f32.mrf.mxu1  ;;  %1807 = vmatprep.mubr.msk.bf16.mxu0 %vm1876_vm0, %v1875_v1  ;;  %1800 = vmatpush3.bf16.msra.mxu0 %v1839_v14 }
 0x8e9   : > { %1801 = vmatprep.subr.bf16.mxu0 %v1875_v1 }
 0x8ea   : > { %v1784_v62 = vpop.f32.mrf.mxu1 }
 0x8ec   : > { %1802 = vmatpush3.bf16.msra.mxu0 %v1840_v16 }
 0x8ed   : > { %1803 = vmatprep.subr.bf16.mxu0 %v1875_v1 }
 0x8f0   : > { %1804 = vmatpush3.bf16.msra.mxu0 %v1841_v17 }
 0x8f1   : > { %1805 = vmatprep.subr.bf16.mxu0 %v1875_v1  ;;  %v1842_v1 = vld [vmem:[%s2205_s11] sm:$0xff]  }
 0x8f4   : > { %1806 = vmatpush3.bf16.msra.mxu0 %v1842_v1 }
 0x9a7   : > { %v1343_v63 = vpop.f32.mrf.mxu0 }
 0x9a8   : > { %v1349_v0 = vadd.f32 %v1343_v63, %v1189_v48 }
 0x9a9   : > { %v1789_v2 = vpop.f32.mrf.mxu0 }
 0x9aa   : > { %v1350_v31 = vadd.f32 %v1349_v0, %v2001_v9  ;;  %v1838_v9 = vld [vmem:[%s2204_s10] sm:$0xff]  }
 0x9ab   : > { %v1346_v4 = vpop.f32.mrf.mxu0  ;;  %1794 = vmatpush3.bf16.msra.mxu1 %v1838_v9 }
 0x9ac   : > { %v1354_v5 = vsel %vm1353_vm9, %v1350_v31, 0.0 }
 0x9ad   : > { %1355 = vadd.xlane.f32.xlu0 %v1354_v5  ;;  %v1790_v6 = vpop.f32.mrf.mxu0 }
 0xa36   : > { %v1356_v7 = vpop.xlane.xlu0 %1355 }
 0xa37   : > { %v1358_v8 = vmul.f32 0.03125, %v1356_v7 }
 0xa39   : > { %v1359_v10 = vsub.f32 %v1350_v31, %v1358_v8 }
 0xa3b   : > { %v1360_v11 = vmul.f32 %v1359_v10, %v1359_v10 }
 0xa3d   : > { %v1361_v12 = vsel %vm1353_vm9, %v1360_v11, 0.0 }
 0xa3e   : > { %1362 = vadd.xlane.f32.xlu0 %v1361_v12 }
 0xac7   : > { %v1363_v18 = vpop.xlane.xlu0 %1362 }
 0xac8   : > { %v1364_v20 = vmul.f32 0.03125, %v1363_v18 }
 0xaca   : > { %v1365_v19 = vadd.f32 1e-05, %v1364_v20 }
 0xacc   : > { %1863 = vrsqrt.f32 %v1365_v19 }
 0xad9   : > { %v1864_v22 = vpop.eup %1863 }
 0xada   : > { %v1367_v24 = vmul.f32 %v1864_v22, %v1359_v10 }
 0xadc   : > { %v1374_v26 = vmul.f32 %v1640_v23, %v1367_v24 }
 0xade   : > { %v1381_v27 = vadd.f32 %v1641_v25, %v1374_v26 }
 0xae0   : > { %v1382_v15 = vpack.c.bf16 %v1381_v27, %v1381_v27 }
 0xae2   : > { %1796 = vmatmul.mubr.msk.bf16.vlgmr.msra.gmra.mxu1 %vm498_vm1, %v1382_v15 }
 0xba2   : > { %v1436_v28 = vpop.f32.mrf.mxu1 }
 0xba3   : > { %v1442_v29 = vmax.f32 %v1436_v28, 0.0 }
 0xba4   : > { %v1797_v30 = vpop.f32.mrf.mxu1 }
 0xba5   : > { %v1443_v32 = vpack.c.bf16 %v1442_v29, %v1442_v29 }
 0xba6   : > { %v1439_v33 = vpop.f32.mrf.mxu1 }
 0xba7   : > { %1808 = vmatmul.mubr.msk.bf16.vlgmr.msra.gmra.mxu0 %vm1476_vm10, %v1443_v32 }
 0xba8   : > { %v1798_v34 = vpop.f32.mrf.mxu1 }
 0xc67   : > { %v1514_v35 = vpop.f32.mrf.mxu0 }
 0xc68   : > { %v1515_v36 = vadd.f32 %v1514_v35, %v1381_v27 }
 0xc69   : > { %v1809_v21 = vpop.f32.mrf.mxu0 }
 0xc6a   : > { %v1522_v37 = vsel %vm1353_vm9, %v1515_v36, 0.0 }
 0xc6b   : > { %1523 = vadd.xlane.f32.xlu0 %v1522_v37  ;;  %v1517_v38 = vpop.f32.mrf.mxu0 }
 0xc6d   : > { %v1810_v39 = vpop.f32.mrf.mxu0 }
 0xcf4   : > { %v1524_v40 = vpop.xlane.xlu0 %1523 }
 0xcf5   : > { %v1525_v41 = vmul.f32 0.03125, %v1524_v40 }
 0xcf7   : > { %v1526_v42 = vsub.f32 %v1515_v36, %v1525_v41 }
 0xcf9   : > { %v1527_v43 = vmul.f32 %v1526_v42, %v1526_v42 }
 0xcfb   : > { %v1528_v44 = vsel %vm1353_vm9, %v1527_v43, 0.0 }
 0xcfc   : > { %1529 = vadd.xlane.f32.xlu1 %v1528_v44 }
 0xd85   : > { %v1530_v45 = vpop.xlane.xlu1 %1529 }
 0xd86   : > { %v1531_v46 = vmul.f32 0.03125, %v1530_v45 }
 0xd88   : > { %v1532_v47 = vadd.f32 1e-05, %v1531_v46 }
 0xd8a   : > { %1865 = vrsqrt.f32 %v1532_v47 }
 0xd97   : > { %v1866_v48 = vpop.eup %1865 }
 0xd98   : > { %v1534_v49 = vmul.f32 %v1866_v48, %v1526_v42 }
 0xd9a   : > { %v1541_v51 = vmul.f32 %v1650_v3, %v1534_v49 }
 0xd9c   : > { %v1548_v52 = vadd.f32 %v1651_v50, %v1541_v51 }
 0xd9e   : > { %1549 = vst.msk [vmem:[%s476_s18] sm:$0xf] %vm1353_vm9, %v1548_v52 }
 0xd9f PF: > { %s24_s29 = sadd.s32 1, %s1873_s29  }
 0xda0   : > { %p21_p4 = scmp.ge.s32.totalorder %s24_s29, 4  }
 0xda2   :  { %23 = sbr.rel (!%p21_p4) target bundleno = 1 (0x1), region = 109 }

// kernel: isab_forward.3
= control target key start
LH: loop header
LB: loop body
LE: loop exit
PB: predicated region body
PF: predicated region fallthrough
CT: control target
= control target key end

     0   :  { %s2411_s0 = inlined_call_operand.vmem [shape: f32[2,8,32], index: 0, kind: input, shape index: {}]   ;;  %s2412_s1 = inlined_call_operand.vmem [shape: f32[2,4,32], index: 1, kind: input, shape index: {}]   ;;  %s2413_s2 = inlined_call_operand.vmem [shape: f32[2,8,1], index: 2, kind: input, shape index: {}]   ;;  %s2414_s3 = inlined_call_operand.vmem [shape: f32[1,1,4], index: 3, kind: input, shape index: {}]   ;;  %s2415_s4 = inlined_call_operand.vmem [shape: bf16[32,32], index: 4, kind: input, shape index: {}]   ;;  %s2416_s5 = inlined_call_operand.vmem [shape: bf16[32,32], index: 5, kind: input, shape index: {}]   ;;  %s2417_s6 = inlined_call_operand.vmem [shape: bf16[32,32], index: 6, kind: input, shape index: {}]   ;;  %s2418_s7 = inlined_call_operand.vmem [shape: bf16[32,32], index: 7, kind: input, shape index: {}]   ;;  %s2419_s8 = inlined_call_operand.vmem [shape: f32[1,32], index: 8, kind: input, shape index: {}]   ;;  %s2420_s9 = inlined_call_operand.vmem [shape: f32[1,32], index: 9, kind: input, shape index: {}]   ;;  %s2421_s10 = inlined_call_operand.vmem [shape: bf16[32,64], index: 10, kind: input, shape index: {}]   ;;  %s2422_s11 = inlined_call_operand.vmem [shape: bf16[64,32], index: 11, kind: input, shape index: {}]   ;;  %s2423_s12 = inlined_call_operand.vmem [shape: f32[1,32], index: 12, kind: input, shape index: {}]   ;;  %s2424_s13 = inlined_call_operand.vmem [shape: f32[1,32], index: 13, kind: input, shape index: {}]   ;;  %s2425_s14 = inlined_call_operand.hbm [shape: f32[2,8,32], index: 14, kind: output, shape index: {}]  }
   0x1   :  { %2431 = sst [smem:[#allocation10_spill]] %s2415_s4 }
   0x2   :  { %19 = vsyncpa [#allocation3], 0 }
   0x3   :  { %21 = vsyncpa [#allocation3 + $0x1], 0  ;;  %s2100_s29 = smov 0   ;;  %s2102_s30 = smov 0  }
   0x4   :  { %s2104_s15 = smov 0   ;;  %s2106_s16 = smov 0  }
   0x5 LB: > { %2432 = sst [smem:[#allocation5_spill]] %s2004_s29  ;;  %s2121_s17 = sadd.s32 4294967295, %s2016_s16   ;;  %s2016_s16 = sphi %s2106_s16, %s2442_s16   ;;  %s2012_s15 = sphi %s2104_s15, %s2444_s15   ;;  %s2008_s30 = sphi %s2102_s30, %s2446_s30   ;;  %s2004_s29 = sphi %s2100_s29, %s2445_s29  }
   0x6   : > { %2433 = sst [smem:[#allocation6_spill]] %s2012_s15  ;;  %s1667_s18 = sadd.s32 4294967294, %s2016_s16  }
   0x7   : > { %s2125_s19 = sadd.s32 1, %s2016_s16   ;;  %s343_s20 = sadd.s32 1, %s2012_s15 }
   0x8   : > { %2434 = sst [smem:[#allocation7_spill]] %s2125_s19  ;;  %s340_s21 = ssub.s32 %s2016_s16, %s2125_s19 }
   0x9   : > { %p353_p0 = scmp.ne.s32.totalorder %s2012_s15, %s2008_s30  ;;  %p341_p1 = scmp.eq.s32.totalorder %s340_s21, 0 }
   0xa   : > { %p354_p2 = scmp.eq.s32.totalorder %s2121_s17, 1  ;;  %p359_p3 = scmp.ne.s32.totalorder %s2008_s30, %s2004_s29 }
   0xb   : > { %p360_p4 = scmp.eq.s32.totalorder %s1667_s18, 1  ;;  %p1670_p7 = scmp.ge.s32.totalorder %s2016_s16, 1 }
   0xc   : > { %s2136_s22 = scalar_select %p341_p1, %s2012_s15, %s343_s20  }
   0xd   : > { %p2138_p5 = por %p354_p2, %p353_p0  ;;  %p2142_p6 = por %p360_p4, %p359_p3 }
   0xe   : > { %2435 = sst [smem:[#allocation8_spill]] %s2136_s22  ;;  %p432_p8 = scmp.lt.s32.totalorder %s2016_s16, 3 }
   0xf   : > { %s2437_s24 = scalar_select %p2142_p6, 1, 0 }
  0x10   : > { %p433_p9 = pnand %p1670_p7, %p432_p8 }
  0x11   : > { %2438 = sst [smem:[#allocation9_spill]] %s2437_s24  ;;  %p485_p10 = scmp.lt.s32.totalorder (!%p433_p9), %s2121_s17, 1 }
  0x12   : > { %436 = sbr.rel (%p433_p9) target bundleno = 3511 (0xdb7), region = 76  ;;  %s2439_s4 = sld [smem:[#allocation10_spill]] (!%p433_p9) }
  0x13   : > { %s2023_s24 = smov (!%p433_p9), 104   ;;  %s2024_s15 = smov (!%p433_p9), [#allocation2]  }
  0x14   : > { %s1960_s22 = sshll.u32 (!%p433_p9), %s2024_s15, 4  ;;  %s1961_s22 = int_to_ptr.vmem [resolvable:$false] %s1960_s22 }
  0x17   : > { %v2018_v1 = vmov 0.0   ;;  %vm2019_vm0 = vmmov 0   ;;  %s2163_s18 = scalar_select %p485_p10, %s2121_s17, 1  ;;  %vm518_vm1 = vcmask 261120   ;;  %v1922_v4 = vld [vmem:[%s2416_s5 + $0x8] sm:$0xff]   ;;  %v1923_v6 = vld [vmem:[%s2416_s5] sm:$0xff]  }
  0x18   : > { %v1920_v0 = vld [vmem:[%s2439_s4 + $0x8] sm:$0xff]   ;;  %1753 = vmatprep.subr.bf16.mxu1 %v2018_v1  ;;  %1769 = vmatprep.subr.bf16.mxu0 %v2018_v1  ;;  %v1921_v2 = vld [vmem:[%s2439_s4] sm:$0xff]   ;;  %vm732_vm2 = vcmask 64512   ;;  %s2020_s4 = smov 120   ;;  %vm697_vm3 = vcmask 24576   ;;  %v2022_v29 = vmov 0  }
  0x19   : > { %1754 = vmatpush3.bf16.msra.mxu1 %v1920_v0  ;;  %1757 = vmatprep.mubr.msk.bf16.mxu1 %vm2019_vm0, %v2018_v1  ;;  %s1672_s20 = sshll.u32 %s2163_s18, 3  ;;  %s1673_s21 = sshll.u32 %s2163_s18, 2  ;;  %v2211_v21 = vld [vmem:[%s2414_s3] sm:$0x1]  ;;  %v1924_v24 = vld [vmem:[%s2417_s6 + $0x8] sm:$0xff]   ;;  %vm779_vm4 = vcmask 31744  }
  0x1a   : > { %1755 = vmatprep.subr.bf16.mxu1 %v2018_v1  ;;  %1773 = vmatprep.mubr.msk.bf16.mxu0 %vm2019_vm0, %v2018_v1  ;;  %s488_s27 = scalar_lea.vmem %s2411_s0, %s1672_s20  ;;  %s492_s19 = scalar_lea.vmem %s2412_s1, %s1673_s21  ;;  %v696_v22 = vmul.f32 %v2211_v21, %v2211_v21  ;;  %v1925_v25 = vld [vmem:[%s2417_s6] sm:$0xff]   ;;  %vm684_vm5 = vcmask 7168   ;;  %vm796_vm6 = vcmask 1041408   ;;  %vm961_vm9 = vcmask 1043456  }
  0x1b   : > { %v498_v3 = vld [vmem:[%s488_s27] sm:$0xff]  ;;  %1770 = vmatpush3.bf16.msra.mxu0 %v1924_v24  ;;  %s496_s28 = scalar_lea.vmem %s2413_s2, %s1672_s20  ;;  %1918 = vset.pattern.permute.xlu1 %v2022_v29  ;;  %vm1496_vm10 = vcmask 523264  }
  0x1c   : > { %v499_v5 = vpack.c.bf16 %v498_v3, %v498_v3  ;;  %v500_v7 = vld [vmem:[%s492_s19] sm:$0xf]  ;;  %v698_v23 = vsel %vm697_vm3, %v696_v22, 0.0  ;;  %s2021_s19 = smov 112   ;;  %1771 = vmatprep.subr.bf16.mxu0 %v2018_v1  ;;  %1919 = vset.pattern.permute.xlu0 %v2022_v29 }
  0x1d   : > { %1756 = vmatpush3.bf16.msra.mxu1 %v1921_v2  ;;  %v501_v8 = vpack.c.bf16 %v500_v7, %v500_v7  ;;  %v681_v30 = vld [vmem:[%s496_s28] sm:$0xff] }
  0x1e   : > { %1761 = vmatprep.subr.bf16.mxu1 %v2018_v1  ;;  %v683_v31 = vmul.f32 %v681_v30, %v681_v30 }
  0x1f   : > { %1772 = vmatpush3.bf16.msra.mxu0 %v1925_v25 }
  0x20   : > { %1758 = vmatmul.mubr.msk.bf16.vlgmr.msra.gmra.mxu1 %vm518_vm1, %v499_v5  ;;  %1783 = vmatprep.subr.bf16.mxu0 %v2018_v1  ;;  %v685_v35 = vsel %vm684_vm5, %v683_v31, 0.0 }
  0x21   : > { %1762 = vmatpush3.bf16.msra.mxu1 %v1922_v4  ;;  %1765 = vmatprep.mubr.msk.bf16.mxu1 %vm2019_vm0, %v2018_v1 }
  0x22   : > { %1763 = vmatprep.subr.bf16.mxu1 %v2018_v1  ;;  %1774 = vmatmul.mubr.msk.bf16.vlgmr.msra.gmra.mxu0 %vm518_vm1, %v501_v8 }
  0x23   : > { %1785 = vmatprep.mubr.msk.bf16.mxu0 %vm2019_vm0, %v2018_v1 }
  0x25   : > { %1764 = vmatpush3.bf16.msra.mxu1 %v1923_v6 }
  0x26   : > { %1777 = vmatprep.subr.bf16.mxu1 %v2018_v1 }
  0x28   : > { %1766 = vmatmul.mubr.msk.bf16.vlgmr.msra.gmra.mxu1 %vm518_vm1, %v501_v8 }
  0x29   : > { %1779 = vmatprep.mubr.msk.bf16.mxu1 %vm2019_vm0, %v2018_v1 }
  0xe0   : > { %v2190_v9 = vpop.f32.mrf.mxu1 }
  0xe1   : > { %v677_v14 = vmul.f32 0.35355338, %v2190_v9 }
  0xe2   : > { %v1759_v10 = vpop.f32.mrf.mxu1  ;;  %v671_v53 = vpop.f32.mrf.mxu0 }
  0xe3   : > { %v2199_v19 = vpack.c.bf16 %v677_v14, %v677_v14  ;;  %v2241_v3 = vpack.c.bf16 %v671_v53, %v671_v53 }
  0xe4   : > { %v559_v11 = vpop.f32.mrf.mxu1  ;;  %v1775_v55 = vpop.f32.mrf.mxu0 }
  0xe5   : > { %v798_v4 = vsel %vm796_vm6, %v2241_v3, 0 }
  0xe6   : > { %v1760_v12 = vpop.f32.mrf.mxu1  ;;  %v674_v59 = vpop.f32.mrf.mxu0  ;;  %1784 = vmatpush3.bf16.msra.mxu0 %v798_v4 }
  0xe7   : > { %1795 = vmatprep.subr.bf16.mxu0 %v2018_v1 }
  0xe8   : > { %v615_v13 = vpop.f32.mrf.mxu1  ;;  %v1776_v61 = vpop.f32.mrf.mxu0 }
  0xe9   : > { %v2193_v15 = vpack.c.bf16 %v615_v13, %v615_v13 }
  0xea   : > { %v1767_v16 = vpop.f32.mrf.mxu1 }
  0xeb   : > { %846 = vrot.lane.b32.xlu0 %v2193_v15, %s2020_s4  ;;  %v737_v17 = vsel %vm732_vm2, %v2193_v15, 0 }
  0xec   : > { %v618_v18 = vpop.f32.mrf.mxu1  ;;  %1778 = vmatpush3.bf16.xpose.msra.mxu1 %v737_v17 }
  0xed   : > { %1789 = vmatprep.subr.bf16.mxu1 %v2018_v1 }
  0xee   : > { %v1768_v20 = vpop.f32.mrf.mxu1 }
  0xef   : > { %843 = vrot.lane.b32.xlu0 %v2199_v19, %s2020_s4 }
  0xf3   : > { %1780 = vmatmul.mubr.msk.bf16.vlgmr.msra.gmra.mxu1 %vm732_vm2, %v2199_v19 }
  0xf4   : > { %1791 = vmatprep.mubr.msk.bf16.mxu1 %vm2019_vm0, %v2018_v1 }
 0x10e   : > { %699 = vadd.xlane.f32.xlu0 %v698_v23  ;;  %v725_v23 = vlaneseq }
 0x110   : > { %v726_v25 = vshrl.u32 %v725_v23, 7 }
 0x124   : > { %1053 = vrot.lane.b32.xlu0 %v2193_v15, %s2021_s19 }
 0x15d   : > { %v847_v26 = vpop.permute.xlu0 %846 }
 0x15e   : > { %v852_v27 = vsel %vm732_vm2, %v847_v26, 0 }
 0x15f   : > { %1790 = vmatpush3.bf16.xpose.msra.mxu1 %v852_v27  ;;  %v727_v27 = vsub.s32 0, %v726_v25 }
 0x160   : > { %1801 = vmatprep.subr.bf16.mxu1 %v2018_v1 }
 0x161   : > { %v844_v28 = vpop.permute.xlu0 %843 }
 0x166   : > { %1792 = vmatmul.mubr.msk.bf16.vlgmr.msra.gmra.mxu1 %vm732_vm2, %v844_v28  ;;  %v728_v28 = vrot.slane %v2211_v21, %v727_v27 }
 0x167   : > { %1803 = vmatprep.mubr.msk.bf16.mxu1 %vm2019_vm0, %v2018_v1 }
 0x197   : > { %v700_v43 = vpop.xlane.xlu0 %699 }
 0x198   : > { %v701_v44 = vrot.slane %v700_v43, 4 }
 0x19a   : > { %v702_v45 = vadd.f32 %v701_v44, %v700_v43 }
 0x19c   : > { %v703_v47 = vrot.slane %v702_v45, 2 }
 0x19e   : > { %v704_v51 = vadd.f32 %v703_v47, %v702_v45 }
 0x1a0   : > { %v705_v57 = vrot.slane %v704_v51, 1 }
 0x1a2   : > { %v706_v62 = vadd.f32 %v705_v57, %v704_v51  ;;  %v1054_v51 = vpop.permute.xlu0 %1053 }
 0x1a3   : > { %v1059_v55 = vsel %vm732_vm2, %v1054_v51, 0 }
 0x1b3   : > { %v773_v32 = vpop.f32.mrf.mxu1 }
 0x1b4   : > { %v780_v33 = vsel %vm779_vm4, %v773_v32, -inf }
 0x1b5   : > { %781 = vmax.xlane.f32.xlu1 %v780_v33  ;;  %v1781_v34 = vpop.f32.mrf.mxu1 }
 0x1b7   : > { %v776_v36 = vpop.f32.mrf.mxu1 }
 0x1b8   : > { %v957_v36 = vld [vmem:[%s2418_s7 + $0x4] sm:$0xf] }
 0x1b9   : > { %v1782_v37 = vpop.f32.mrf.mxu1  ;;  %686 = vadd.xlane.f32.xlu1 %v685_v35  ;;  %v963_v21 = vsel %vm961_vm9, %v957_v36, 0 }
 0x1ba   : > { %1802 = vmatpush3.bf16.msra.mxu1 %v963_v21 }
 0x1bb   : > { %1813 = vmatprep.subr.bf16.mxu1 %v2018_v1 }
 0x226   : > { %v888_v38 = vpop.f32.mrf.mxu1 }
 0x227   : > { %v894_v39 = vsel %vm779_vm4, %v888_v38, -inf }
 0x228   : > { %895 = vmax.xlane.f32.xlu1 %v894_v39  ;;  %v1793_v40 = vpop.f32.mrf.mxu1 }
 0x22a   : > { %v891_v41 = vpop.f32.mrf.mxu1 }
 0x22c   : > { %v1794_v42 = vpop.f32.mrf.mxu1 }
 0x22d   : > { %v841_v42 = vld [vmem:[%s2418_s7] sm:$0xf] }
 0x22e   : > { %v1009_v45 = vsel %vm961_vm9, %v841_v42, 0 }
 0x239   : > { %721 = vperm.xlu1 %1918, %v681_v30  }
 0x23e   : > { %v782_v46 = vpop.xlane.xlu1 %781 }
 0x23f   : > { %v783_v50 = vsub.f32 %v773_v32, %v782_v46 }
 0x241   : > { %v784_v56 = vmul.f32 1.442695, %v783_v50 }
 0x242   : > { %v687_v48 = vpop.xlane.xlu1 %686 }
 0x243   : > { %v688_v49 = vrot.slane %v687_v48, 4  ;;  %1932 = vpow2.f32 %v784_v56 }
 0x245   : > { %v689_v52 = vadd.f32 %v688_v49, %v687_v48 }
 0x247   : > { %v690_v54 = vrot.slane %v689_v52, 2 }
 0x249   : > { %v691_v58 = vadd.f32 %v690_v54, %v689_v52 }
 0x24b   : > { %v692_v60 = vrot.slane %v691_v58, 1 }
 0x24d   : > { %v693_v63 = vadd.f32 %v692_v60, %v691_v58 }
 0x24f   : > { %1869 = vpush %v693_v63 }
 0x250   : > { %1871 = vpush %v706_v62  ;;  %v1933_v0 = vpop.eup %1932 }
 0x251   : > { %v786_v2 = vsel %vm779_vm4, %v1933_v0, 0.0 }
 0x25d   : > { %787 = vadd.xlane.f32.xlu1 %v786_v2 }
 0x280   : > { %s1870_s18 = spop %1869 }
 0x281   : > { %s1872_s20 = spop %1871  ;;  %v695_v8 = vstv %s1870_s18 }
 0x282   : > { %v708_v10 = vstv %s1872_s20  ;;  %s482_s20 = sand.u32 1, %s2008_s30  }
 0x283   : > { %v709_v11 = vmul.f32 %v708_v10, %v695_v8  ;;  %s1571_s18 = scalar_lea.sflag [#allocation3], %s482_s20 }
 0x285   : > { %vm712_vm7 = vcmp.eq.f32.partialorder %v709_v11, inf  ;;  %v715_v17 = vand.u32 2147483648, %v709_v11  ;;  %vm714_vm8 = vcmp.eq.f32.partialorder %v709_v11, 0.0 }
 0x2b1   : > { %v896_v5 = vpop.xlane.xlu1 %895 }
 0x2b2   : > { %v897_v6 = vsub.f32 %v888_v38, %v896_v5 }
 0x2b4   : > { %v898_v7 = vmul.f32 1.442695, %v897_v6 }
 0x2b5   : > { %v722_v24 = vpop.permute.xlu1 %721 }
 0x2b6   : > { %1934 = vpow2.f32 %v898_v7  ;;  %v730_v29 = vmul.f32 %v728_v28, %v722_v24 }
 0x2b7   : > { %1936 = vrsqrt.f32 %v709_v11 }
 0x2c3   : > { %v1935_v12 = vpop.eup %1934 }
 0x2c4   : > { %v900_v13 = vsel %vm779_vm4, %v1935_v12, 0.0  ;;  %v1937_v14 = vpop.eup %1936 }
 0x2c5   : > { %901 = vadd.xlane.f32.xlu1 %v900_v13  ;;  %v711_v16 = vmul.f32 %v1937_v14, %v709_v11 }
 0x2c7   : > { %v713_v18 = vsel %vm712_vm7, %v709_v11, %v711_v16 }
 0x2c8   : > { %v716_v20 = vsel %vm714_vm8, %v715_v17, %v713_v18 }
 0x2c9   : > { %v717_v22 = vadd.f32 1e-05, %v716_v20 }
 0x2cb   : > { %1938 = vrcp.f32 %v717_v22 }
 0x2d6   : > { %908 = vrot.lane.b32.xlu1 %v2241_v3, %s2020_s4  ;;  %s1671_s4 = sshll.u32 %s482_s20, 3 }
 0x2d7   : > { %s484_s21 = scalar_lea.vmem [#allocation2], %s1671_s4 }
 0x2d8   : > { %v1939_v30 = vpop.eup %1938  ;;  %s1584_s25 = sshll.u32 %s484_s21, 4  ;;  %s1585_s25 = int_to_ptr.vmem [resolvable:$true] %s1584_s25 }
 0x2d9   : > { %v2252_v31 = vmul.f32 %v1939_v30, %v730_v29  ;;  %s1956_s29 = scalar_lea.vmem %s1585_s25, 128  ;;  %p1963_p0 = scmp.lt.s32.totalorder %s1585_s25, %s1961_s22 }
 0x2da   : > { %1051 = vrot.lane.b32.xlu1 %v2199_v19, %s2021_s19  ;;  %p1957_p11 = scmp.ne.s32.totalorder %s1585_s25, %s1956_s29 }
 0x2dc   : > { %p1958_p12 = pnand %p1957_p11, %p2138_p5 }
 0x2de   : > { %p1959_p13 = pneg %p1958_p12 }
 0x2e6   : > { %v788_v26 = vpop.xlane.xlu1 %787 }
 0x2e7   : > { %1940 = vrcp.f32 %v788_v26 }
 0x2f4   : > { %v1941_v32 = vpop.eup %1940 }
 0x2f5   : > { %v790_v33 = vmul.f32 %v1941_v32, %v1933_v0 }
 0x2f7   : > { %v791_v34 = vadd.f32 %v790_v33, %v2252_v31 }
 0x2f9   : > { %v792_v35 = vpack.c.bf16 %v791_v34, %v791_v34 }
 0x2fb   : > { %1786 = vmatmul.mubr.msk.bf16.vlgmr.msra.gmra.mxu0 %vm779_vm4, %v792_v35 }
 0x2fc   : > { %1797 = vmatprep.mubr.msk.bf16.mxu0 %vm2019_vm0, %v2018_v1 }
 0x34e   : > { %v902_v37 = vpop.xlane.xlu1 %901 }
 0x34f   : > { %1942 = vrcp.f32 %v902_v37 }
 0x352   : > { %v909_v38 = vpop.permute.xlu1 %908 }
 0x353   : > { %v914_v39 = vsel %vm796_vm6, %v909_v38, 0 }
 0x354   : > { %1796 = vmatpush3.bf16.msra.mxu0 %v914_v39 }
 0x355   : > { %1807 = vmatprep.subr.bf16.mxu0 %v2018_v1 }
 0x356   : > { %v1052_v58 = vpop.permute.xlu1 %1051 }
 0x35c   : > { %v1943_v40 = vpop.eup %1942 }
 0x35d   : > { %v904_v41 = vmul.f32 %v1943_v40, %v1935_v12 }
 0x35f   : > { %v905_v43 = vadd.f32 %v904_v41, %v2252_v31 }
 0x361   : > { %v906_v44 = vpack.c.bf16 %v905_v43, %v905_v43 }
 0x363   : > { %1798 = vmatmul.mubr.msk.bf16.vlgmr.msra.gmra.mxu0 %vm779_vm4, %v906_v44 }
 0x364   : > { %1808 = vmatpush3.bf16.msra.mxu0 %v1009_v45  ;;  %1809 = vmatprep.mubr.msk.bf16.mxu0 %vm2019_vm0, %v2018_v1 }
 0x365   : > { %1819 = vmatprep.subr.bf16.mxu0 %v2018_v1 }
 0x3bb   : > { %v834_v46 = vpop.f32.mrf.mxu0 }
 0x3bc   : > { %v840_v47 = vpack.c.bf16 %v834_v46, %v834_v46 }
 0x3bd   : > { %v1787_v48 = vpop.f32.mrf.mxu0 }
 0x3be   : > { %1810 = vmatmul.mubr.msk.bf16.vlgmr.msra.gmra.mxu0 %vm732_vm2, %v840_v47 }
 0x3bf   : > { %v837_v49 = vpop.f32.mrf.mxu0  ;;  %1821 = vmatprep.mubr.msk.bf16.mxu0 %vm2019_vm0, %v2018_v1 }
 0x3c0   : > { %v1323_v49 = vld [vmem:[%s2418_s7 + $0xc] sm:$0xf] }
 0x3c1   : > { %v1788_v50 = vpop.f32.mrf.mxu0 }
 0x3c2   : > { %v1328_v50 = vsel %vm961_vm9, %v1323_v49, 0 }
 0x423   : > { %v950_v52 = vpop.f32.mrf.mxu0 }
 0x424   : > { %v956_v53 = vpack.c.bf16 %v950_v52, %v950_v52 }
 0x425   : > { %v1799_v54 = vpop.f32.mrf.mxu0 }
 0x426   : > { %1804 = vmatmul.mubr.msk.bf16.vlgmr.msra.gmra.mxu1 %vm732_vm2, %v956_v53 }
 0x427   : > { %1814 = vmatpush3.bf16.xpose.msra.mxu1 %v1059_v55  ;;  %v953_v56 = vpop.f32.mrf.mxu0  ;;  %1815 = vmatprep.mubr.msk.bf16.mxu1 %vm2019_vm0, %v2018_v1 }
 0x428   : > { %1825 = vmatprep.subr.bf16.mxu1 %v2018_v1 }
 0x429   : > { %v1800_v57 = vpop.f32.mrf.mxu0 }
 0x42e   : > { %1816 = vmatmul.mubr.msk.bf16.vlgmr.msra.gmra.mxu1 %vm732_vm2, %v1052_v58 }
 0x42f   : > { %1827 = vmatprep.mubr.msk.bf16.mxu1 %vm2019_vm0, %v2018_v1 }
 0x47e   : > { %v2285_v59 = vpop.f32.mrf.mxu0 }
 0x480   : > { %v1811_v60 = vpop.f32.mrf.mxu0 }
 0x482   : > { %v1048_v61 = vpop.f32.mrf.mxu0 }
 0x484   : > { %v1812_v62 = vpop.f32.mrf.mxu0 }
 0x4e6   : > { %v2287_v63 = vpop.f32.mrf.mxu1 }
 0x4e7   : > { %v1046_v46 = vadd.f32 %v2285_v59, %v2287_v63 }
 0x4e8   : > { %v1805_v0 = vpop.f32.mrf.mxu1 }
 0x4ea   : > { %v1002_v2 = vpop.f32.mrf.mxu1 }
 0x4ec   : > { %v1806_v4 = vpop.f32.mrf.mxu1 }
 0x4ee   : > { %v1095_v5 = vpop.f32.mrf.mxu1 }
 0x4ef   : > { %v1101_v6 = vsel %vm779_vm4, %v1095_v5, -inf }
 0x4f0   : > { %1102 = vmax.xlane.f32.xlu1 %v1101_v6  ;;  %v1817_v7 = vpop.f32.mrf.mxu1 }
 0x4f2   : > { %v1098_v8 = vpop.f32.mrf.mxu1 }
 0x4f4   : > { %v1818_v10 = vpop.f32.mrf.mxu1 }
 0x501   : > { %1114 = vrot.lane.b32.xlu1 %v2241_v3, %s2021_s19  ;;  %s1709_s19 = sshll.u32 %s2121_s17, 7  ;;  %s1962_s17 = scalar_lea.vmem %s1961_s22, 256 }
 0x502   : > { %s1582_s28 = scalar_lea.hbm %s2425_s14, %s1709_s19  ;;  %p1964_p1 = scmp.lt.s32.totalorder %s1962_s17, %s1956_s29 }
 0x504   : > { %p1965_p2 = por %p1964_p1, %p1963_p0 }
 0x505   : > { %1211 = vrot.lane.b32.xlu1 %v2199_v19, %s2023_s24 }
 0x506   : > { %p1966_p3 = pnand %p1965_p2, %p1959_p13 }
 0x579   : > { %v1103_v11 = vpop.xlane.xlu1 %1102 }
 0x57a   : > { %v1104_v12 = vsub.f32 %v1095_v5, %v1103_v11 }
 0x57c   : > { %v1105_v13 = vmul.f32 1.442695, %v1104_v12 }
 0x57d   : > { %v1115_v14 = vpop.permute.xlu1 %1114 }
 0x57e   : > { %1944 = vpow2.f32 %v1105_v13  ;;  %v1120_v16 = vsel %vm796_vm6, %v1115_v14, 0  ;;  %v1926_v13 = vld [vmem:[%s2421_s10 + $0x8] sm:$0xff]   ;;  %v1928_v14 = vld [vmem:[%s2422_s11 + $0x18] sm:$0xff]  }
 0x57f   : > { %1820 = vmatpush3.bf16.msra.mxu0 %v1120_v16  ;;  %v1929_v16 = vld [vmem:[%s2422_s11 + $0x10] sm:$0xff]  }
 0x580   : > { %1831 = vmatprep.subr.bf16.mxu0 %v2018_v1 }
 0x581   : > { %v1212_v27 = vpop.permute.xlu1 %1211 }
 0x58b   : > { %v1945_v17 = vpop.eup %1944 }
 0x58c   : > { %v1107_v18 = vsel %vm779_vm4, %v1945_v17, 0.0 }
 0x58d   : > { %1108 = vadd.xlane.f32.xlu0 %v1107_v18 }
 0x5a3   : > { %1213 = vrot.lane.b32.xlu0 %v2193_v15, %s2023_s24  ;;  %v1163_v15 = vld [vmem:[%s2418_s7 + $0x8] sm:$0xf] }
 0x5a4   : > { %v1168_v28 = vsel %vm961_vm9, %v1163_v15, 0 }
 0x5a5   : > { %1826 = vmatpush3.bf16.msra.mxu1 %v1168_v28 }
 0x5a6   : > { %1837 = vmatprep.subr.bf16.mxu1 %v2018_v1 }
 0x616   : > { %v1109_v20 = vpop.xlane.xlu0 %1108 }
 0x617   : > { %1946 = vrcp.f32 %v1109_v20 }
 0x61a   : > { %v1214_v24 = vpop.permute.xlu0 %1213 }
 0x61b   : > { %v1219_v26 = vsel %vm732_vm2, %v1214_v24, 0 }
 0x624   : > { %v1947_v19 = vpop.eup %1946 }
 0x625   : > { %v1111_v22 = vmul.f32 %v1947_v19, %v1945_v17  ;;  %v1930_v17 = vld [vmem:[%s2422_s11 + $0x8] sm:$0xff]  }
 0x627   : > { %v1112_v23 = vadd.f32 %v1111_v22, %v2252_v31 }
 0x629   : > { %v1113_v25 = vpack.c.bf16 %v1112_v23, %v1112_v23  ;;  %v1696_v23 = vld [vmem:[%s2419_s8] ss:$0 sm:$0xff] }
 0x62b   : > { %1822 = vmatmul.mubr.msk.bf16.vlgmr.msra.gmra.mxu0 %vm779_vm4, %v1113_v25  ;;  %v1697_v25 = vld [vmem:[%s2420_s9] ss:$0 sm:$0xff] }
 0x62c   : > { %1832 = vmatpush3.bf16.xpose.msra.mxu0 %v1219_v26  ;;  %1833 = vmatprep.mubr.msk.bf16.mxu0 %vm2019_vm0, %v2018_v1 }
 0x62d   : > { %1843 = vmatprep.subr.bf16.mxu0 %v2018_v1 }
 0x633   : > { %1834 = vmatmul.mubr.msk.bf16.vlgmr.msra.gmra.mxu0 %vm732_vm2, %v1212_v27 }
 0x634   : > { %1845 = vmatprep.mubr.msk.bf16.mxu0 %vm2019_vm0, %v2018_v1  ;;  %1844 = vmatpush3.bf16.msra.mxu0 %v1328_v50  ;;  %v1707_v50 = vld [vmem:[%s2424_s13] ss:$0 sm:$0xff] }
 0x635   : > { %1857 = vmatprep.subr.bf16.mxu0 %v2018_v1 }
 0x6eb   : > { %v1156_v29 = vpop.f32.mrf.mxu0 }
 0x6ec   : > { %v1162_v30 = vpack.c.bf16 %v1156_v29, %v1156_v29 }
 0x6ed   : > { %v1823_v32 = vpop.f32.mrf.mxu0 }
 0x6ee   : > { %1828 = vmatmul.mubr.msk.bf16.vlgmr.msra.gmra.mxu1 %vm732_vm2, %v1162_v30 }
 0x6ef   : > { %v1159_v33 = vpop.f32.mrf.mxu0  ;;  %1839 = vmatprep.mubr.msk.bf16.mxu1 %vm2019_vm0, %v2018_v1 }
 0x6f1   : > { %v1824_v34 = vpop.f32.mrf.mxu0 }
 0x6f3   : > { %v1255_v35 = vpop.f32.mrf.mxu0 }
 0x6f4   : > { %v1261_v36 = vsel %vm779_vm4, %v1255_v35, -inf }
 0x6f5   : > { %1262 = vmax.xlane.f32.xlu1 %v1261_v36  ;;  %v1835_v21 = vpop.f32.mrf.mxu0 }
 0x6f7   : > { %v1258_v37 = vpop.f32.mrf.mxu0 }
 0x6f9   : > { %v1836_v38 = vpop.f32.mrf.mxu0 }
 0x706   : > { %1274 = vrot.lane.b32.xlu1 %v2241_v3, %s2023_s24 }
 0x77e   : > { %v1263_v39 = vpop.xlane.xlu1 %1262 }
 0x77f   : > { %v1264_v40 = vsub.f32 %v1255_v35, %v1263_v39 }
 0x781   : > { %v1265_v41 = vmul.f32 1.442695, %v1264_v40 }
 0x782   : > { %v1275_v42 = vpop.permute.xlu1 %1274 }
 0x783   : > { %1948 = vpow2.f32 %v1265_v41  ;;  %v1280_v43 = vsel %vm796_vm6, %v1275_v42, 0 }
 0x784   : > { %1838 = vmatpush3.bf16.msra.mxu1 %v1280_v43 }
 0x785   : > { %1849 = vmatprep.subr.bf16.mxu1 %v2018_v1 }
 0x790   : > { %v1949_v44 = vpop.eup %1948 }
 0x791   : > { %v1267_v45 = vsel %vm779_vm4, %v1949_v44, 0.0 }
 0x792   : > { %1268 = vadd.xlane.f32.xlu0 %v1267_v45 }
 0x7ae   : > { %v1204_v47 = vpop.f32.mrf.mxu1 }
 0x7af   : > { %v1210_v48 = vadd.f32 %v1204_v47, %v1046_v46 }
 0x7b0   : > { %v1829_v3 = vpop.f32.mrf.mxu1 }
 0x7b1   : > { %v1706_v3 = vld [vmem:[%s2423_s12] ss:$0 sm:$0xff] }
 0x7b2   : > { %v1207_v51 = vpop.f32.mrf.mxu1 }
 0x7b4   : > { %v1830_v52 = vpop.f32.mrf.mxu1 }
 0x81b   : > { %v1269_v53 = vpop.xlane.xlu0 %1268 }
 0x81c   : > { %1950 = vrcp.f32 %v1269_v53 }
 0x829   : > { %v1951_v54 = vpop.eup %1950 }
 0x82a   : > { %v1271_v55 = vmul.f32 %v1951_v54, %v1949_v44 }
 0x82c   : > { %v1272_v56 = vadd.f32 %v1271_v55, %v2252_v31 }
 0x82e   : > { %v1273_v57 = vpack.c.bf16 %v1272_v56, %v1272_v56 }
 0x830   : > { %1840 = vmatmul.mubr.msk.bf16.vlgmr.msra.gmra.mxu1 %vm779_vm4, %v1273_v57 }
 0x831   : > { %1853 = vmatprep.mubr.msk.bf16.mxu1 %vm2019_vm0, %v2018_v1  ;;  %1850 = vmatpush3.bf16.msra.mxu1 %v1926_v13 }
 0x832   : > { %1851 = vmatprep.subr.bf16.mxu1 %v2018_v1 }
 0x8f0   : > { %v1316_v58 = vpop.f32.mrf.mxu1 }
 0x8f1   : > { %v1322_v59 = vpack.c.bf16 %v1316_v58, %v1316_v58 }
 0x8f2   : > { %v1841_v60 = vpop.f32.mrf.mxu1 }
 0x8f3   : > { %1846 = vmatmul.mubr.msk.bf16.vlgmr.msra.gmra.mxu0 %vm732_vm2, %v1322_v59 }
 0x8f4   : > { %v1319_v61 = vpop.f32.mrf.mxu1  ;;  %1865 = vmatprep.mubr.msk.bf16.mxu0 %vm2019_vm0, %v2018_v1  ;;  %1858 = vmatpush3.bf16.msra.mxu0 %v1928_v14 }
 0x8f5   : > { %1859 = vmatprep.subr.bf16.mxu0 %v2018_v1 }
 0x8f6   : > { %v1842_v62 = vpop.f32.mrf.mxu1 }
 0x8f8   : > { %1860 = vmatpush3.bf16.msra.mxu0 %v1929_v16 }
 0x8f9   : > { %1861 = vmatprep.subr.bf16.mxu0 %v2018_v1 }
 0x8fc   : > { %1862 = vmatpush3.bf16.msra.mxu0 %v1930_v17 }
 0x8fd   : > { %1863 = vmatprep.subr.bf16.mxu0 %v2018_v1  ;;  %v1931_v1 = vld [vmem:[%s2422_s11] sm:$0xff]  }
 0x900   : > { %1864 = vmatpush3.bf16.msra.mxu0 %v1931_v1 }
 0x9b3   : > { %v1364_v63 = vpop.f32.mrf.mxu0 }
 0x9b4   : > { %v1370_v0 = vadd.f32 %v1364_v63, %v1210_v48 }
 0x9b5   : > { %v1847_v2 = vpop.f32.mrf.mxu0 }
 0x9b6   : > { %v1371_v31 = vadd.f32 %v1370_v0, %v2190_v9  ;;  %v1927_v9 = vld [vmem:[%s2421_s10] sm:$0xff]  }
 0x9b7   : > { %v1367_v4 = vpop.f32.mrf.mxu0  ;;  %1852 = vmatpush3.bf16.msra.mxu1 %v1927_v9 }
 0x9b8   : > { %v1374_v5 = vsel %vm518_vm1, %v1371_v31, 0.0 }
 0x9b9   : > { %1375 = vadd.xlane.f32.xlu0 %v1374_v5  ;;  %v1848_v6 = vpop.f32.mrf.mxu0 }
 0xa42   : > { %v1376_v7 = vpop.xlane.xlu0 %1375 }
 0xa43   : > { %v1378_v8 = vmul.f32 0.03125, %v1376_v7 }
 0xa45   : > { %v1379_v10 = vsub.f32 %v1371_v31, %v1378_v8 }
 0xa47   : > { %v1380_v11 = vmul.f32 %v1379_v10, %v1379_v10 }
 0xa49   : > { %v1381_v12 = vsel %vm518_vm1, %v1380_v11, 0.0 }
 0xa4a   : > { %1382 = vadd.xlane.f32.xlu0 %v1381_v12 }
 0xad3   : > { %v1383_v18 = vpop.xlane.xlu0 %1382 }
 0xad4   : > { %v1384_v20 = vmul.f32 0.03125, %v1383_v18 }
 0xad6   : > { %v1385_v19 = vadd.f32 1e-05, %v1384_v20 }
 0xad8   : > { %1952 = vrsqrt.f32 %v1385_v19 }
 0xae5   : > { %v1953_v22 = vpop.eup %1952 }
 0xae6   : > { %v1387_v24 = vmul.f32 %v1953_v22, %v1379_v10 }
 0xae8   : > { %v1394_v26 = vmul.f32 %v1696_v23, %v1387_v24 }
 0xaea   : > { %v1401_v27 = vadd.f32 %v1697_v25, %v1394_v26 }
 0xaec   : > { %v1402_v15 = vpack.c.bf16 %v1401_v27, %v1401_v27 }
 0xaee   : > { %1854 = vmatmul.mubr.msk.bf16.vlgmr.msra.gmra.mxu1 %vm518_vm1, %v1402_v15 }
 0xbae   : > { %v1456_v28 = vpop.f32.mrf.mxu1 }
 0xbaf   : > { %v1462_v29 = vmax.f32 %v1456_v28, 0.0 }
 0xbb0   : > { %v1855_v30 = vpop.f32.mrf.mxu1 }
 0xbb1   : > { %v1463_v32 = vpack.c.bf16 %v1462_v29, %v1462_v29 }
 0xbb2   : > { %v1459_v33 = vpop.f32.mrf.mxu1 }
 0xbb3   : > { %1866 = vmatmul.mubr.msk.bf16.vlgmr.msra.gmra.mxu0 %vm1496_vm10, %v1463_v32 }
 0xbb4   : > { %v1856_v34 = vpop.f32.mrf.mxu1 }
 0xc73   : > { %v1534_v35 = vpop.f32.mrf.mxu0 }
 0xc74   : > { %v1535_v36 = vadd.f32 %v1534_v35, %v1401_v27 }
 0xc75   : > { %v1867_v21 = vpop.f32.mrf.mxu0 }
 0xc76   : > { %v1542_v37 = vsel %vm518_vm1, %v1535_v36, 0.0 }
 0xc77   : > { %1543 = vadd.xlane.f32.xlu0 %v1542_v37  ;;  %v1537_v38 = vpop.f32.mrf.mxu0 }
 0xc79   : > { %v1868_v39 = vpop.f32.mrf.mxu0 }
 0xd00   : > { %v1544_v40 = vpop.xlane.xlu0 %1543 }
 0xd01   : > { %v1545_v41 = vmul.f32 0.03125, %v1544_v40 }
 0xd03   : > { %v1546_v42 = vsub.f32 %v1535_v36, %v1545_v41 }
 0xd05   : > { %v1547_v43 = vmul.f32 %v1546_v42, %v1546_v42 }
 0xd07   : > { %v1548_v44 = vsel %vm518_vm1, %v1547_v43, 0.0 }
 0xd08   : > { %1549 = vadd.xlane.f32.xlu1 %v1548_v44 }
 0xd91   : > { %v1550_v45 = vpop.xlane.xlu1 %1549 }
 0xd92   : > { %v1551_v46 = vmul.f32 0.03125, %v1550_v45 }
 0xd94   : > { %v1552_v47 = vadd.f32 1e-05, %v1551_v46 }
 0xd96   : > { %1954 = vrsqrt.f32 %v1552_v47 }
 0xda3   : > { %v1955_v48 = vpop.eup %1954 }
 0xda4   : > { %v1554_v49 = vmul.f32 %v1955_v48, %v1546_v42 }
 0xda6   : > { %v1561_v51 = vmul.f32 %v1706_v3, %v1554_v49 }
 0xda8   : > { %v1568_v52 = vadd.f32 %v1707_v50, %v1561_v51 }
 0xdaa   : > { %1569 = vst.msk [vmem:[%s484_s21] sm:$0xff] %vm518_vm1, %v1568_v52 }
 0xdab   : > { %1969 = shalt.err (!%p1966_p3)
}
 0xdac   : > { %s1970_s4 = scalar_lea.hbm %s1582_s28, 128  ;;  %s1974_s19 = scalar_lea.hbm %s2425_s14, 256 }
 0xdad   : > { %p1971_p4 = scmp.ne.s32.totalorder %s1582_s28, %s1970_s4  ;;  %p1975_p9 = scmp.lt.s32.totalorder %s1582_s28, %s2425_s14 }
 0xdae   : > { %p1976_p10 = scmp.lt.s32.totalorder %s1974_s19, %s1970_s4 }
 0xdaf   : > { %p1972_p7 = pnand %p1971_p4, %p2138_p5 }
 0xdb0   : > { %p1977_p11 = por %p1976_p10, %p1975_p9 }
 0xdb1   : > { %p1973_p8 = pneg %p1972_p7 }
 0xdb3   : > { %p1978_p12 = pnand %p1977_p11, %p1973_p8 }
 0xdb5   : > { %1981 = shalt.err (!%p1978_p12)
}
 0xdb6   : > { %1873 = dma.vmem_to_hbm [thread:$0]  (%p2138_p5), %s1585_s25, 128, %s1582_s28, %s1571_s18  }
 0xdb7 PF: > { %s2440_s27 = sld [smem:[#allocation5_spill]]  ;;  %p1879_p13 = scmp.ge.s32.totalorder %s2016_s16, 2 }
 0xdb9   : > { %p1876_p0 = pnand %p1879_p13, %p2142_p6 }
 0xdbb   : > { %p1877_p1 = pneg %p1876_p0 }
 0xdbd   : > { %s1596_s15 = sand.u32 1, %s2440_s27  }
 0xdbe   : > { %s1597_s22 = scalar_lea.sflag [#allocation3], %s1596_s15 }
 0xdbf   : > { %1999 = dma.done.wait (%p1877_p1), %s1597_s22, 128  }
 0xdc0   : > { %2001 = vsyncadd (%p1877_p1), %s1597_s22, 4294967168  ;;  %s2442_s16 = sld [smem:[#allocation7_spill]]  ;;  %s2445_s29 = smov %s2008_s30 }
 0xdc1   : > { %s2443_s17 = sld [smem:[#allocation6_spill]] }
 0xdc2   : > { %s2444_s15 = sld [smem:[#allocation8_spill]] }
 0xdc6   : > { %p24_p2 = scmp.ge.s32.totalorder %s2442_s16, 4  }
 0xdc7   : > { %s2446_s30 = smov %s2443_s17 }
 0xdc8   :  { %26 = sbr.rel (!%p24_p2) target bundleno = 5 (0x5), region = 117 }
 0xdcd   :  { %1602 = vsyncpa [#allocation3], 1 }
 0xdce   :  { %1604 = vsyncpa [#allocation3 + $0x1], 1 }

</bundles_post_ra>
